<compile_context>
chip_gen: v6e
topology: v6e:2x2x1
jax: 0.10.0
libtpu: 0.0.40
codegen_flags: <defaults>
</compile_context>

<pallas_src>
import math

import jax
import jax.numpy as jnp
from jax.experimental import pallas as pl
from jax.experimental.pallas import tpu as pltpu

OUT_PAD = 128  # lane-dense padded width for the 2-class output


def mlp_kernel(x_ref, w1_ref, b1_ref, w2_ref, b2_ref, w3_ref, b3_ref, o_ref):
    # fc1 + ReLU (bf16 operands, f32 MXU accumulation). Cast x in-kernel.
    x = x_ref[...].astype(jnp.bfloat16)
    h1 = jnp.dot(x, w1_ref[...], preferred_element_type=jnp.float32)
    h1 = jnp.maximum(h1 + b1_ref[...], 0.0).astype(jnp.bfloat16)
    # dropout(p=0.2) is identity in eval-mode forward.
    # TODO(synk): training-mode dropout (pltpu.prng_random_bits mask) not needed here.
    # fc2 + ReLU
    h2 = jnp.dot(h1, w2_ref[...], preferred_element_type=jnp.float32)
    h2 = jnp.maximum(h2 + b2_ref[...], 0.0).astype(jnp.bfloat16)
    # fc3 (logits, padded to 128 lanes; no activation). bf16 writeback.
    o = jnp.dot(h2, w3_ref[...], preferred_element_type=jnp.float32)
    o_ref[...] = (o + b3_ref[...]).astype(o_ref.dtype)


def three_layer_classifier(x, params, *, tile_b=512):
    """x: (B, dim) float32.  params: transposed bf16 weights, f32 biases."""
    w1, b1, w2, b2, w3, b3 = (
        params["w1"], params["b1"], params["w2"], params["b2"],
        params["w3"], params["b3"],
    )
    B, dim = x.shape

    # Pad batch to a multiple of 16 (bf16 sublane packing), then pick a tile.
    bp = max(16, ((B + 15) // 16) * 16)
    if bp < 256:
        tb = bp  # tiny batch: one step; the cost here is the weight fetch anyway
    else:
        # Keep >= 2 grid steps so v7x's two TensorCores can split the batch.
        tb = min(tile_b, max(128, bp // 2))
        tb = max(16, (tb // 16) * 16)
        bp = pl.cdiv(bp, tb) * tb
    if bp != B:
        x = jnp.pad(x, ((0, bp - B), (0, 0)))

    h1, h2 = w1.shape[1], w2.shape[1]
    flops = 2 * bp * (dim * h1 + h1 * h2 + h2 * OUT_PAD)
    bytes_accessed = int(
        bp * dim * x.dtype.itemsize          # x (f32 in, cast in-kernel)
        + (w1.size + w2.size + w3.size) * 2  # weights (bf16)
        + (b1.size + b2.size + b3.size) * 4  # biases (f32)
        + bp * OUT_PAD * 2                   # output (bf16)
    )

    operands = (x, w1, b1, w2, b2, w3, b3)
    in_specs = [pl.BlockSpec((tb, dim), lambda i: (i, 0))]
    # Weights/biases: full-array blocks, constant block index -> VMEM-resident
    # across the grid; single-buffered (no point double-buffering a constant).
    in_specs += [
        pl.BlockSpec(op.shape, lambda i: (0, 0),
                     pipeline_mode=pl.Buffered(buffer_count=1))
        for op in operands[1:]
    ]

    out = pl.pallas_call(
        mlp_kernel,
        out_shape=jax.ShapeDtypeStruct((bp, OUT_PAD), jnp.bfloat16),
        grid=(bp // tb,),
        in_specs=in_specs,
        out_specs=pl.BlockSpec((tb, OUT_PAD), lambda i: (i, 0)),
        compiler_params=pltpu.CompilerParams(
            dimension_semantics=("parallel",),
            vmem_limit_bytes=32 << 20,
        ),
        cost_estimate=pl.CostEstimate(
            flops=flops, transcendentals=0, bytes_accessed=bytes_accessed),
    )(*operands)
    # Slice the 2 real logit lanes; return f32 for parity with the nn.Module.
    return out[:B, :2].astype(jnp.float32)


def init_params(key, dim):
    """Init mimicking nn.Linear's U(-1/sqrt(fan_in), 1/sqrt(fan_in)).
    Weights stored transposed to (in, out) in bf16; biases f32.
    Final layer zero-padded from 2 -> OUT_PAD output columns (lane-dense)."""
    def linear(key, fan_in, fan_out, pad_to=None):
        kw, kb = jax.random.split(key)
        bound = 1.0 / math.sqrt(fan_in)
        w = jax.random.uniform(kw, (fan_in, fan_out), jnp.float32, -bound, bound)
        b = jax.random.uniform(kb, (1, fan_out), jnp.float32, -bound, bound)
        if pad_to is not None and pad_to > fan_out:
            w = jnp.pad(w, ((0, 0), (0, pad_to - fan_out)))
            b = jnp.pad(b, ((0, 0), (0, pad_to - fan_out)))
        return w.astype(jnp.bfloat16), b  # bf16 weights, f32 biases

    k1, k2, k3 = jax.random.split(key, 3)
    w1, b1 = linear(k1, dim, 1024)
    w2, b2 = linear(k2, 1024, 512)
    w3, b3 = linear(k3, 512, 2, pad_to=OUT_PAD)
    return {"w1": w1, "b1": b1, "w2": w2, "b2": b2, "w3": w3, "b3": b3}


if __name__ == "__main__":
    key = jax.random.PRNGKey(0)
    k_param, k_x = jax.random.split(key)

    B, DIM = 8, 256  # small synthetic shapes: batch=8, feature dim=256
    params = init_params(k_param, DIM)
    x = jax.random.normal(k_x, (B, DIM), jnp.float32)

    out = three_layer_classifier(x, params)
    out = jax.block_until_ready(out)

    # Pure-JAX reference on the same bf16 weight / activation dtype path.
    # NOTE: validates the kernel against its own bf16 numerics, not an f32
    # PyTorch model (bf16 weights are an accepted inference approximation).
    xb = x.astype(jnp.bfloat16)
    r1 = jnp.maximum(
        jnp.dot(xb, params["w1"], preferred_element_type=jnp.float32)
        + params["b1"], 0.0).astype(jnp.bfloat16)
    r2 = jnp.maximum(
        jnp.dot(r1, params["w2"], preferred_element_type=jnp.float32)
        + params["b2"], 0.0).astype(jnp.bfloat16)
    ref = (jnp.dot(r2, params["w3"], preferred_element_type=jnp.float32)
           + params["b3"])[:, :2]
    ref = ref.astype(jnp.bfloat16).astype(jnp.float32)  # match bf16 writeback

    assert out.shape == (B, 2)
    assert jnp.allclose(out, ref, atol=2e-2, rtol=2e-2)

    print("KERNEL_OK")
</pallas_src>

<mosaic_0001>
module attributes {stable_mosaic.version = 11 : i64} {
  func.func @mlp_kernel(%arg0: i32, %arg1: memref<16x256xf32, #tpu.memory_space<vmem>>, %arg2: memref<256x1024xbf16, #tpu.memory_space<vmem>>, %arg3: memref<1x1024xf32, #tpu.memory_space<vmem>>, %arg4: memref<1024x512xbf16, #tpu.memory_space<vmem>>, %arg5: memref<1x512xf32, #tpu.memory_space<vmem>>, %arg6: memref<512x128xbf16, #tpu.memory_space<vmem>>, %arg7: memref<1x128xf32, #tpu.memory_space<vmem>>, %arg8: memref<16x128xbf16, #tpu.memory_space<vmem>>) attributes {dimension_semantics = [#tpu.dimension_semantics<parallel>], iteration_bounds = array<i64: 1>, scalar_prefetch = 0 : i64, scratch_operands = 0 : i64, tpu.core_type = #tpu.core_type<tc>, window_params = [{transform_indices = @transform_0, window_bounds = array<i64: 16, 256>}, {pipeline_mode = #tpu.pipeline_mode<synchronous>, transform_indices = @transform_1, window_bounds = array<i64: 256, 1024>}, {pipeline_mode = #tpu.pipeline_mode<synchronous>, transform_indices = @transform_2, window_bounds = array<i64: 1, 1024>}, {pipeline_mode = #tpu.pipeline_mode<synchronous>, transform_indices = @transform_3, window_bounds = array<i64: 1024, 512>}, {pipeline_mode = #tpu.pipeline_mode<synchronous>, transform_indices = @transform_4, window_bounds = array<i64: 1, 512>}, {pipeline_mode = #tpu.pipeline_mode<synchronous>, transform_indices = @transform_5, window_bounds = array<i64: 512, 128>}, {pipeline_mode = #tpu.pipeline_mode<synchronous>, transform_indices = @transform_6, window_bounds = array<i64: 1, 128>}, {transform_indices = @transform_7, window_bounds = array<i64: 16, 128>}]} {
    %c0 = arith.constant 0 : index
    %c0_0 = arith.constant 0 : index
    %0 = vector.load %arg1[%c0, %c0_0] : memref<16x256xf32, #tpu.memory_space<vmem>>, vector<16x256xf32>
    %1 = arith.truncf %0 : vector<16x256xf32> to vector<16x256xbf16>
    %c0_1 = arith.constant 0 : index
    %c0_2 = arith.constant 0 : index
    %2 = vector.load %arg2[%c0_1, %c0_2] : memref<256x1024xbf16, #tpu.memory_space<vmem>>, vector<256x1024xbf16>
    %cst = arith.constant dense<0.000000e+00> : vector<16x1024xf32>
    %3 = tpu.matmul %1, %2, %cst {dimension_numbers = #tpu.dot_dimension_numbers<[1], [0], [0], [1], [0, 0, 1, 1], [], []>} : vector<16x256xbf16>, vector<256x1024xbf16>, vector<16x1024xf32> -> vector<16x1024xf32>
    %c0_3 = arith.constant 0 : index
    %c0_4 = arith.constant 0 : index
    %4 = vector.load %arg3[%c0_3, %c0_4] : memref<1x1024xf32, #tpu.memory_space<vmem>>, vector<1x1024xf32>
    %5 = vector.broadcast %4 : vector<1x1024xf32> to vector<16x1024xf32>
    %6 = arith.addf %3, %5 : vector<16x1024xf32>
    %cst_5 = arith.constant 0.000000e+00 : f32
    %7 = vector.broadcast %cst_5 : f32 to vector<16x1024xf32>
    %8 = arith.maximumf %6, %7 : vector<16x1024xf32>
    %9 = arith.truncf %8 : vector<16x1024xf32> to vector<16x1024xbf16>
    %c0_6 = arith.constant 0 : index
    %c0_7 = arith.constant 0 : index
    %10 = vector.load %arg4[%c0_6, %c0_7] : memref<1024x512xbf16, #tpu.memory_space<vmem>>, vector<1024x512xbf16>
    %cst_8 = arith.constant dense<0.000000e+00> : vector<16x512xf32>
    %11 = tpu.matmul %9, %10, %cst_8 {dimension_numbers = #tpu.dot_dimension_numbers<[1], [0], [0], [1], [0, 0, 1, 1], [], []>} : vector<16x1024xbf16>, vector<1024x512xbf16>, vector<16x512xf32> -> vector<16x512xf32>
    %c0_9 = arith.constant 0 : index
    %c0_10 = arith.constant 0 : index
    %12 = vector.load %arg5[%c0_9, %c0_10] : memref<1x512xf32, #tpu.memory_space<vmem>>, vector<1x512xf32>
    %13 = vector.broadcast %12 : vector<1x512xf32> to vector<16x512xf32>
    %14 = arith.addf %11, %13 : vector<16x512xf32>
    %cst_11 = arith.constant 0.000000e+00 : f32
    %15 = vector.broadcast %cst_11 : f32 to vector<16x512xf32>
    %16 = arith.maximumf %14, %15 : vector<16x512xf32>
    %17 = arith.truncf %16 : vector<16x512xf32> to vector<16x512xbf16>
    %c0_12 = arith.constant 0 : index
    %c0_13 = arith.constant 0 : index
    %18 = vector.load %arg6[%c0_12, %c0_13] : memref<512x128xbf16, #tpu.memory_space<vmem>>, vector<512x128xbf16>
    %cst_14 = arith.constant dense<0.000000e+00> : vector<16x128xf32>
    %19 = tpu.matmul %17, %18, %cst_14 {dimension_numbers = #tpu.dot_dimension_numbers<[1], [0], [0], [1], [0, 0, 1, 1], [], []>} : vector<16x512xbf16>, vector<512x128xbf16>, vector<16x128xf32> -> vector<16x128xf32>
    %c0_15 = arith.constant 0 : index
    %c0_16 = arith.constant 0 : index
    %20 = vector.load %arg7[%c0_15, %c0_16] : memref<1x128xf32, #tpu.memory_space<vmem>>, vector<1x128xf32>
    %21 = vector.broadcast %20 : vector<1x128xf32> to vector<16x128xf32>
    %22 = arith.addf %19, %21 : vector<16x128xf32>
    %23 = arith.truncf %22 : vector<16x128xf32> to vector<16x128xbf16>
    %c0_17 = arith.constant 0 : index
    %c0_18 = arith.constant 0 : index
    %24 = vector.load %arg8[%c0_17, %c0_18] : memref<16x128xbf16, #tpu.memory_space<vmem>>, vector<16x128xbf16>
    tpu.vector_store %arg8[%c0_17, %c0_18], %23 {strides = array<i32>} : memref<16x128xbf16, #tpu.memory_space<vmem>>, vector<16x128xbf16>,
    return
  }
  func.func @transform_0(%arg0: i32) -> (i32, i32) {
    %c0_i32 = arith.constant 0 : i32
    %c0_i32_0 = arith.constant 0 : i32
    return %arg0, %c0_i32 : i32, i32
  }
  func.func @transform_1(%arg0: i32) -> (i32, i32) {
    %c0_i32 = arith.constant 0 : i32
    %c0_i32_0 = arith.constant 0 : i32
    %c0_i32_1 = arith.constant 0 : i32
    return %c0_i32, %c0_i32_0 : i32, i32
  }
  func.func @transform_2(%arg0: i32) -> (i32, i32) {
    %c0_i32 = arith.constant 0 : i32
    %c0_i32_0 = arith.constant 0 : i32
    %c0_i32_1 = arith.constant 0 : i32
    return %c0_i32, %c0_i32_0 : i32, i32
  }
  func.func @transform_3(%arg0: i32) -> (i32, i32) {
    %c0_i32 = arith.constant 0 : i32
    %c0_i32_0 = arith.constant 0 : i32
    %c0_i32_1 = arith.constant 0 : i32
    return %c0_i32, %c0_i32_0 : i32, i32
  }
  func.func @transform_4(%arg0: i32) -> (i32, i32) {
    %c0_i32 = arith.constant 0 : i32
    %c0_i32_0 = arith.constant 0 : i32
    %c0_i32_1 = arith.constant 0 : i32
    return %c0_i32, %c0_i32_0 : i32, i32
  }
  func.func @transform_5(%arg0: i32) -> (i32, i32) {
    %c0_i32 = arith.constant 0 : i32
    %c0_i32_0 = arith.constant 0 : i32
    %c0_i32_1 = arith.constant 0 : i32
    return %c0_i32, %c0_i32_0 : i32, i32
  }
  func.func @transform_6(%arg0: i32) -> (i32, i32) {
    %c0_i32 = arith.constant 0 : i32
    %c0_i32_0 = arith.constant 0 : i32
    %c0_i32_1 = arith.constant 0 : i32
    return %c0_i32, %c0_i32_0 : i32, i32
  }
  func.func @transform_7(%arg0: i32) -> (i32, i32) {
    %c0_i32 = arith.constant 0 : i32
    %c0_i32_0 = arith.constant 0 : i32
    return %arg0, %c0_i32 : i32, i32
  }
}

</mosaic_0001>

<bundles_post_ra>
// kernel: tpu_custom_call.1
= control target key start
LH: loop header
LB: loop body
LE: loop exit
PB: predicated region body
PF: predicated region fallthrough
CT: control target
= control target key end

     0   :  { %12 = vsyncpa [#allocation3], 0  ;;  %s4582_s0 = inlined_call_operand.hbm [shape: f32[16,256], index: 0, kind: input, shape index: {}]   ;;  %s4583_s1 = inlined_call_operand.hbm [shape: bf16[256,1024], index: 1, kind: input, shape index: {}]   ;;  %s4584_s2 = inlined_call_operand.hbm [shape: f32[1,1024], index: 2, kind: input, shape index: {}]   ;;  %s4585_s3 = inlined_call_operand.hbm [shape: bf16[1024,512], index: 3, kind: input, shape index: {}]   ;;  %s4586_s4 = inlined_call_operand.vmem [shape: f32[1,512], index: 4, kind: input, shape index: {}]   ;;  %s4587_s5 = inlined_call_operand.hbm [shape: bf16[512,128], index: 5, kind: input, shape index: {}]   ;;  %s4588_s6 = inlined_call_operand.vmem [shape: f32[1,128], index: 6, kind: input, shape index: {}]   ;;  %s4589_s7 = inlined_call_operand.hbm [shape: bf16[16,128], index: 7, kind: output, shape index: {}]  }
   0x1   :  { %13 = vsyncpa [#allocation6], 0 }
   0x2   :  { %14 = vsyncpa [#allocation9], 0 }
   0x3   :  { %15 = vsyncpa [#allocation4], 0  ;;  %s4420_s24 = smov [#allocation5]  }
   0x4   :  { %s33_s25 = sshll.u32 %s4420_s24, 4  ;;  %s34_s25 = int_to_ptr.vmem [resolvable:$true] %s33_s25 }
   0x5   :  { %s4300_s26 = scalar_lea.vmem %s34_s25, 16384  ;;  %p4305_p1 = scmp.lt.s32.totalorder %s34_s25, %s34_s25 }
   0x6   :  { %p4301_p0 = scmp.ne.s32.totalorder %s34_s25, %s4300_s26  ;;  %p4306_p2 = scmp.lt.s32.totalorder %s4300_s26, %s4300_s26 }
   0x8   :  { %p4307_p3 = por %p4306_p2, %p4305_p1 }
   0xa   :  { %p4308_p4 = pnand %p4307_p3, %p4301_p0 }
   0xc   :  { %4311 = shalt.err (!%p4308_p4)
}
   0xd   :  { %s4421_s27 = smov 512   ;;  %s4422_s28 = smov 32  }
   0xe   :  { %39 = dma.hbm_to_vmem [thread:$0]  %s4583_s1, 16384, %s34_s25, [#allocation6], %s4421_s27, %s4421_s27, %s4422_s28  }
   0xf   :  { %s4423_s8 = smov [#allocation8]   ;;  %s4424_s10 = smov [#allocation2]  }
  0x10   :  { %s55_s9 = sshll.u32 %s4423_s8, 4  ;;  %s21_s11 = sshll.u32 %s4424_s10, 4  ;;  %s56_s9 = int_to_ptr.vmem [resolvable:$true] %s55_s9  ;;  %s22_s11 = int_to_ptr.vmem [resolvable:$true] %s21_s11 }
  0x11   :  { %s4320_s12 = scalar_lea.vmem %s56_s9, 32768  ;;  %p4325_p6 = scmp.lt.s32.totalorder %s56_s9, %s56_s9 }
  0x12   :  { %p4321_p5 = scmp.ne.s32.totalorder %s56_s9, %s4320_s12  ;;  %p4326_p7 = scmp.lt.s32.totalorder %s4320_s12, %s4320_s12 }
  0x14   :  { %p4327_p8 = por %p4326_p7, %p4325_p6 }
  0x16   :  { %p4328_p9 = pnand %p4327_p8, %p4321_p5 }
  0x18   :  { %4331 = shalt.err (!%p4328_p9)
}
  0x19   :  { %s4425_s13 = smov 256   ;;  %s4426_s14 = smov 16  }
  0x1a   :  { %61 = dma.hbm_to_vmem [thread:$0]  %s4585_s3, 32768, %s56_s9, [#allocation9], %s4425_s13, %s4425_s13, %s4426_s14  }
  0x1b   :  { %s4340_s1 = scalar_lea.vmem %s22_s11, 512  ;;  %p4345_p11 = scmp.lt.s32.totalorder %s22_s11, %s22_s11 }
  0x1c   :  { %p4341_p10 = scmp.ne.s32.totalorder %s22_s11, %s4340_s1  ;;  %p4346_p12 = scmp.lt.s32.totalorder %s4340_s1, %s4340_s1 }
  0x1e   :  { %p4347_p13 = por %p4346_p12, %p4345_p11 }
  0x20   :  { %p4348_p0 = pnand %p4347_p13, %p4341_p10 }
  0x22   :  { %4351 = shalt.err (!%p4348_p0)
}
  0x23   :  { %27 = dma.hbm_to_vmem [thread:$0]  %s4582_s0, 512, %s22_s11, [#allocation3], %s4425_s13, %s4425_s13, %s4426_s14  }
  0x24   :  { %s4427_s19 = smov [#allocation7]   ;;  %s4428_s21 = smov [#allocation10]  }
  0x25   :  { %s46_s20 = sshll.u32 %s4427_s19, 4  ;;  %s69_s22 = sshll.u32 %s4428_s21, 4  ;;  %s47_s20 = int_to_ptr.vmem [resolvable:$true] %s46_s20  ;;  %s70_s22 = int_to_ptr.vmem [resolvable:$true] %s69_s22 }
  0x26   :  { %s4360_s23 = scalar_lea.vmem %s47_s20, 128  ;;  %p4365_p2 = scmp.lt.s32.totalorder %s47_s20, %s47_s20 }
  0x27   :  { %p4361_p1 = scmp.ne.s32.totalorder %s47_s20, %s4360_s23  ;;  %p4366_p3 = scmp.lt.s32.totalorder %s4360_s23, %s4360_s23 }
  0x29   :  { %p4367_p4 = por %p4366_p3, %p4365_p2 }
  0x2b   :  { %p4368_p5 = pnand %p4367_p4, %p4361_p1 }
  0x2d   :  { %4371 = shalt.err (!%p4368_p5)
}
  0x2e   :  { %49 = dma.hbm_to_vmem [thread:$0]  %s4584_s2, 128, %s47_s20, [#allocation6]  }
  0x2f   :  { %s4380_s25 = scalar_lea.vmem %s70_s22, 4096  ;;  %p4385_p7 = scmp.lt.s32.totalorder %s70_s22, %s70_s22 }
  0x30   :  { %p4381_p6 = scmp.ne.s32.totalorder %s70_s22, %s4380_s25  ;;  %p4386_p8 = scmp.lt.s32.totalorder %s4380_s25, %s4380_s25 }
  0x32   :  { %p4387_p9 = por %p4386_p8, %p4385_p7 }
  0x34   :  { %p4388_p10 = pnand %p4387_p9, %p4381_p6 }
  0x36   :  { %4391 = shalt.err (!%p4388_p10)
}
  0x37   :  { %s4429_s0 = smov 64   ;;  %s4430_s26 = smov 4  }
  0x38   :  { %75 = dma.hbm_to_vmem [thread:$0]  %s4587_s5, 4096, %s70_s22, [#allocation9], %s4429_s0, %s4429_s0, %s4430_s26  }
  0x39   :  { %4412 = dma.done.wait [#allocation3], 512  }
  0x3a   :  { %4413 = vsyncadd [#allocation3], 4294966784 }
  0x3b   :  { %4414 = dma.done.wait [#allocation6], 16512  }
  0x3c   :  { %4415 = vsyncadd [#allocation6], 4294950784 }
  0x3d   :  { %4416 = dma.done.wait [#allocation9], 36864  }
  0x3e   :  { %4417 = vsyncadd [#allocation9], 4294930432  ;;  %v156_v0 = vld [vmem:[#allocation5 + $0x1c0] sm:$0xff]  ;;  %v157_v2 = vld [vmem:[#allocation5 + $0x1c8] sm:$0xff]  ;;  %s4431_s30 = smov [#allocation11]  }
  0x3f   :  { %v160_v1 = vld [vmem:[#allocation5 + $0x1e0] sm:$0xff]  ;;  %v161_v4 = vld [vmem:[#allocation5 + $0x1e8] sm:$0xff]  ;;  %v97_v54 = vld [vmem:[#allocation2 + $0x18] sm:$0xff]  ;;  %s3380_s8 = sshll.u32 %s4431_s30, 4  ;;  %s3381_s8 = int_to_ptr.vmem [resolvable:$true] %s3380_s8 }
  0x40   :  { %v3451_v3 = vcombine.high %v156_v0, %v160_v1  ;;  %v3450_v5 = vcombine.low %v156_v0, %v160_v1  ;;  %v148_v6 = vld [vmem:[#allocation5 + $0x180] sm:$0xff]  ;;  %v3453_v8 = vcombine.high %v157_v2, %v161_v4  ;;  %v3452_v9 = vcombine.low %v157_v2, %v161_v4  ;;  %v149_v11 = vld [vmem:[#allocation5 + $0x188] sm:$0xff]  ;;  %s4392_s9 = scalar_lea.vmem %s3381_s8, 128  ;;  %p4397_p12 = scmp.lt.s32.totalorder %s3381_s8, %s3381_s8 }
  0x41   :  { %v152_v7 = vld [vmem:[#allocation5 + $0x1a0] sm:$0xff]  ;;  %v153_v12 = vld [vmem:[#allocation5 + $0x1a8] sm:$0xff]  ;;  %p4393_p11 = scmp.ne.s32.totalorder %s3381_s8, %s4392_s9  ;;  %p4398_p13 = scmp.lt.s32.totalorder %s4392_s9, %s4392_s9 }
  0x42   :  { %v3443_v10 = vcombine.high %v148_v6, %v152_v7  ;;  %v140_v13 = vld [vmem:[#allocation5 + $0x140] sm:$0xff]  ;;  %910 = vmatprep.subr.bf16.mxu0 %v3451_v3  ;;  %v3445_v14 = vcombine.high %v149_v11, %v153_v12  ;;  %v141_v16 = vld [vmem:[#allocation5 + $0x148] sm:$0xff]  ;;  %953 = vmatprep.subr.bf16.mxu1 %v3453_v8  ;;  %v3442_v18 = vcombine.low %v148_v6, %v152_v7 }
  0x43   :  { %v144_v15 = vld [vmem:[#allocation5 + $0x160] sm:$0xff]  ;;  %v145_v17 = vld [vmem:[#allocation5 + $0x168] sm:$0xff]  ;;  %911 = vmatpush1.bf16.msra.mxu0 %v3450_v5  ;;  %954 = vmatpush1.bf16.msra.mxu1 %v3452_v9  ;;  %v3444_v19 = vcombine.low %v149_v11, %v153_v12  ;;  %p4399_p0 = por %p4398_p13, %p4397_p12 }
  0x44   :  { %912 = vmatprep.subr.bf16.mxu0 %v3443_v10  ;;  %v3435_v20 = vcombine.high %v140_v13, %v144_v15  ;;  %955 = vmatprep.subr.bf16.mxu1 %v3445_v14  ;;  %v3437_v21 = vcombine.high %v141_v16, %v145_v17  ;;  %v132_v22 = vld [vmem:[#allocation5 + $0x100] sm:$0xff]  ;;  %v133_v24 = vld [vmem:[#allocation5 + $0x108] sm:$0xff]  ;;  %v3434_v26 = vcombine.low %v140_v13, %v144_v15 }
  0x45   :  { %v136_v23 = vld [vmem:[#allocation5 + $0x120] sm:$0xff]  ;;  %v137_v25 = vld [vmem:[#allocation5 + $0x128] sm:$0xff]  ;;  %v3436_v27 = vcombine.low %v141_v16, %v145_v17  ;;  %p4400_p1 = pnand %p4399_p0, %p4393_p11 }
  0x46   :  { %v3427_v28 = vcombine.high %v132_v22, %v136_v23  ;;  %v3429_v29 = vcombine.high %v133_v24, %v137_v25  ;;  %v124_v30 = vld [vmem:[#allocation5 + $0xc0] sm:$0xff]  ;;  %v125_v32 = vld [vmem:[#allocation5 + $0xc8] sm:$0xff]  ;;  %v3426_v34 = vcombine.low %v132_v22, %v136_v23  ;;  %v3428_v35 = vcombine.low %v133_v24, %v137_v25 }
  0x47   :  { %913 = vmatpush1.bf16.msra.mxu0 %v3442_v18  ;;  %956 = vmatpush1.bf16.msra.mxu1 %v3444_v19  ;;  %v128_v31 = vld [vmem:[#allocation5 + $0xe0] sm:$0xff]  ;;  %v129_v33 = vld [vmem:[#allocation5 + $0xe8] sm:$0xff] }
  0x48   :  { %914 = vmatprep.subr.bf16.mxu0 %v3435_v20  ;;  %957 = vmatprep.subr.bf16.mxu1 %v3437_v21  ;;  %v3419_v36 = vcombine.high %v124_v30, %v128_v31  ;;  %v3421_v37 = vcombine.high %v125_v32, %v129_v33  ;;  %v116_v38 = vld [vmem:[#allocation5 + $0x80] sm:$0xff]  ;;  %v117_v40 = vld [vmem:[#allocation5 + $0x88] sm:$0xff]  ;;  %v3418_v42 = vcombine.low %v124_v30, %v128_v31 }
  0x49   :  { %v120_v39 = vld [vmem:[#allocation5 + $0xa0] sm:$0xff]  ;;  %v121_v41 = vld [vmem:[#allocation5 + $0xa8] sm:$0xff]  ;;  %v3420_v43 = vcombine.low %v125_v32, %v129_v33 }
  0x4a   :  { %v3411_v44 = vcombine.high %v116_v38, %v120_v39  ;;  %v3413_v45 = vcombine.high %v117_v40, %v121_v41  ;;  %v108_v46 = vld [vmem:[#allocation5 + $0x40] sm:$0xff]  ;;  %v109_v48 = vld [vmem:[#allocation5 + $0x48] sm:$0xff]  ;;  %v3410_v50 = vcombine.low %v116_v38, %v120_v39  ;;  %v3412_v51 = vcombine.low %v117_v40, %v121_v41 }
  0x4b   :  { %915 = vmatpush1.bf16.msra.mxu0 %v3434_v26  ;;  %958 = vmatpush1.bf16.msra.mxu1 %v3436_v27  ;;  %v112_v47 = vld [vmem:[#allocation5 + $0x60] sm:$0xff]  ;;  %v113_v49 = vld [vmem:[#allocation5 + $0x68] sm:$0xff] }
  0x4c   :  { %916 = vmatprep.subr.bf16.mxu0 %v3427_v28  ;;  %959 = vmatprep.subr.bf16.mxu1 %v3429_v29  ;;  %v3403_v52 = vcombine.high %v108_v46, %v112_v47  ;;  %v95_v53 = vld [vmem:[#allocation2 + $0x8] sm:$0xff]  ;;  %v3405_v55 = vcombine.high %v109_v48, %v113_v49  ;;  %v100_v56 = vld [vmem:[#allocation5] sm:$0xff]  ;;  %v3402_v61 = vcombine.low %v108_v46, %v112_v47 }
  0x4d   :  { %v104_v57 = vld [vmem:[#allocation5 + $0x20] sm:$0xff]  ;;  %v4490_v58 = vpack.c.bf16 %v97_v54, %v95_v53  ;;  %v101_v59 = vld [vmem:[#allocation5 + $0x8] sm:$0xff]  ;;  %v3404_v62 = vcombine.low %v109_v48, %v113_v49 }
  0x4e   :  { %v105_v60 = vld [vmem:[#allocation5 + $0x28] sm:$0xff]  ;;  %v3395_v63 = vcombine.high %v100_v56, %v104_v57  ;;  %v220_v1 = vld [vmem:[#allocation5 + $0x3c0] sm:$0xff]  ;;  %v3394_v5 = vcombine.low %v100_v56, %v104_v57 }
  0x4f   :  { %917 = vmatpush1.bf16.msra.mxu0 %v3426_v34  ;;  %960 = vmatpush1.bf16.msra.mxu1 %v3428_v35  ;;  %v3397_v0 = vcombine.high %v101_v59, %v105_v60  ;;  %v224_v2 = vld [vmem:[#allocation5 + $0x3e0] sm:$0xff]  ;;  %v221_v3 = vld [vmem:[#allocation5 + $0x3c8] sm:$0xff]  ;;  %v3396_v6 = vcombine.low %v101_v59, %v105_v60 }
  0x50   :  { %918 = vmatprep.subr.bf16.mxu0 %v3419_v36  ;;  %961 = vmatprep.subr.bf16.mxu1 %v3421_v37  ;;  %v225_v4 = vld [vmem:[#allocation5 + $0x3e8] sm:$0xff]  ;;  %v3515_v7 = vcombine.high %v220_v1, %v224_v2  ;;  %v212_v9 = vld [vmem:[#allocation5 + $0x380] sm:$0xff]  ;;  %v3514_v13 = vcombine.low %v220_v1, %v224_v2 }
  0x51   :  { %942 = vmatprep.mubr.bf16.mxu0 %v4490_v58  ;;  %985 = vmatprep.mubr.bf16.mxu1 %v4490_v58  ;;  %v3517_v8 = vcombine.high %v221_v3, %v225_v4  ;;  %v216_v10 = vld [vmem:[#allocation5 + $0x3a0] sm:$0xff]  ;;  %v213_v11 = vld [vmem:[#allocation5 + $0x388] sm:$0xff]  ;;  %v3516_v14 = vcombine.low %v221_v3, %v225_v4  ;;  %v158_v3 = vld [vmem:[#allocation5 + $0x1d0] sm:$0xff] }
  0x52   :  { %v217_v12 = vld [vmem:[#allocation5 + $0x3a8] sm:$0xff]  ;;  %v3507_v15 = vcombine.high %v212_v9, %v216_v10  ;;  %v204_v17 = vld [vmem:[#allocation5 + $0x340] sm:$0xff]  ;;  %v3506_v21 = vcombine.low %v212_v9, %v216_v10  ;;  %v162_v4 = vld [vmem:[#allocation5 + $0x1f0] sm:$0xff] }
  0x53   :  { %919 = vmatpush1.bf16.msra.mxu0 %v3418_v42  ;;  %962 = vmatpush1.bf16.msra.mxu1 %v3420_v43  ;;  %v3509_v16 = vcombine.high %v213_v11, %v217_v12  ;;  %v208_v18 = vld [vmem:[#allocation5 + $0x360] sm:$0xff]  ;;  %v205_v19 = vld [vmem:[#allocation5 + $0x348] sm:$0xff]  ;;  %v3508_v22 = vcombine.low %v213_v11, %v217_v12  ;;  %v3455_v10 = vcombine.high %v158_v3, %v162_v4  ;;  %v150_v12 = vld [vmem:[#allocation5 + $0x190] sm:$0xff] }
  0x54   :  { %920 = vmatprep.subr.bf16.mxu0 %v3411_v44  ;;  %963 = vmatprep.subr.bf16.mxu1 %v3413_v45  ;;  %v209_v20 = vld [vmem:[#allocation5 + $0x368] sm:$0xff]  ;;  %v3499_v23 = vcombine.high %v204_v17, %v208_v18  ;;  %v196_v25 = vld [vmem:[#allocation5 + $0x300] sm:$0xff]  ;;  %v3498_v29 = vcombine.low %v204_v17, %v208_v18  ;;  %v3454_v17 = vcombine.low %v158_v3, %v162_v4  ;;  %v226_v3 = vld [vmem:[#allocation5 + $0x3f0] sm:$0xff] }
  0x55   :  { %v3501_v24 = vcombine.high %v205_v19, %v209_v20  ;;  %v200_v26 = vld [vmem:[#allocation5 + $0x320] sm:$0xff]  ;;  %v197_v27 = vld [vmem:[#allocation5 + $0x308] sm:$0xff]  ;;  %v3500_v30 = vcombine.low %v205_v19, %v209_v20 }
  0x56   :  { %v201_v28 = vld [vmem:[#allocation5 + $0x328] sm:$0xff]  ;;  %v3491_v31 = vcombine.high %v196_v25, %v200_v26  ;;  %v188_v33 = vld [vmem:[#allocation5 + $0x2c0] sm:$0xff]  ;;  %v3490_v37 = vcombine.low %v196_v25, %v200_v26 }
  0x57   :  { %921 = vmatpush1.bf16.msra.mxu0 %v3410_v50  ;;  %964 = vmatpush1.bf16.msra.mxu1 %v3412_v51  ;;  %v3493_v32 = vcombine.high %v197_v27, %v201_v28  ;;  %v192_v34 = vld [vmem:[#allocation5 + $0x2e0] sm:$0xff]  ;;  %v189_v35 = vld [vmem:[#allocation5 + $0x2c8] sm:$0xff]  ;;  %v3492_v38 = vcombine.low %v197_v27, %v201_v28 }
  0x58   :  { %922 = vmatprep.subr.bf16.mxu0 %v3403_v52  ;;  %965 = vmatprep.subr.bf16.mxu1 %v3405_v55  ;;  %v193_v36 = vld [vmem:[#allocation5 + $0x2e8] sm:$0xff]  ;;  %v3483_v39 = vcombine.high %v188_v33, %v192_v34  ;;  %v180_v41 = vld [vmem:[#allocation5 + $0x280] sm:$0xff]  ;;  %v3482_v45 = vcombine.low %v188_v33, %v192_v34 }
  0x59   :  { %v3485_v40 = vcombine.high %v189_v35, %v193_v36  ;;  %v184_v42 = vld [vmem:[#allocation5 + $0x2a0] sm:$0xff]  ;;  %v181_v43 = vld [vmem:[#allocation5 + $0x288] sm:$0xff]  ;;  %v3484_v46 = vcombine.low %v189_v35, %v193_v36 }
  0x5a   :  { %v185_v44 = vld [vmem:[#allocation5 + $0x2a8] sm:$0xff]  ;;  %v3475_v47 = vcombine.high %v180_v41, %v184_v42  ;;  %v172_v49 = vld [vmem:[#allocation5 + $0x240] sm:$0xff]  ;;  %v3474_v53 = vcombine.low %v180_v41, %v184_v42 }
  0x5b   :  { %923 = vmatpush1.bf16.msra.mxu0 %v3402_v61  ;;  %966 = vmatpush1.bf16.msra.mxu1 %v3404_v62  ;;  %v3477_v48 = vcombine.high %v181_v43, %v185_v44  ;;  %v176_v50 = vld [vmem:[#allocation5 + $0x260] sm:$0xff]  ;;  %v173_v51 = vld [vmem:[#allocation5 + $0x248] sm:$0xff]  ;;  %v3476_v54 = vcombine.low %v181_v43, %v185_v44  ;;  %v118_v44 = vld [vmem:[#allocation5 + $0x90] sm:$0xff] }
  0x5c   :  { %924 = vmatprep.subr.bf16.mxu0 %v3395_v63  ;;  %967 = vmatprep.subr.bf16.mxu1 %v3397_v0  ;;  %v177_v52 = vld [vmem:[#allocation5 + $0x268] sm:$0xff]  ;;  %v3467_v55 = vcombine.high %v172_v49, %v176_v50  ;;  %v164_v57 = vld [vmem:[#allocation5 + $0x200] sm:$0xff]  ;;  %v3466_v62 = vcombine.low %v172_v49, %v176_v50  ;;  %v110_v49 = vld [vmem:[#allocation5 + $0x50] sm:$0xff] }
  0x5d   :  { %v3469_v56 = vcombine.high %v173_v51, %v177_v52  ;;  %v168_v59 = vld [vmem:[#allocation5 + $0x220] sm:$0xff]  ;;  %v165_v60 = vld [vmem:[#allocation5 + $0x208] sm:$0xff]  ;;  %v3468_v63 = vcombine.low %v173_v51, %v177_v52  ;;  %v114_v50 = vld [vmem:[#allocation5 + $0x70] sm:$0xff] }
  0x5e   :  { %v169_v61 = vld [vmem:[#allocation5 + $0x228] sm:$0xff]  ;;  %v3459_v0 = vcombine.high %v164_v57, %v168_v59  ;;  %v94_v2 = vld [vmem:[#allocation2] sm:$0xff] }
  0x5f   :  { %925 = vmatpush1.bf16.msra.mxu0 %v3394_v5  ;;  %968 = vmatpush1.bf16.msra.mxu1 %v3396_v6  ;;  %v3461_v1 = vcombine.high %v165_v60, %v169_v61  ;;  %v159_v5 = vld [vmem:[#allocation5 + $0x1d8] sm:$0xff]  ;;  %v3460_v9 = vcombine.low %v165_v60, %v169_v61  ;;  %v3407_v61 = vcombine.high %v110_v49, %v114_v50 }
  0x60   :  { %926 = vmatprep.subr.bf16.mxu0 %v3515_v7  ;;  %969 = vmatprep.subr.bf16.mxu1 %v3517_v8  ;;  %v163_v6 = vld [vmem:[#allocation5 + $0x1f8] sm:$0xff]  ;;  %v3458_v7 = vcombine.low %v164_v57, %v168_v59  ;;  %v96_v8 = vld [vmem:[#allocation2 + $0x10] sm:$0xff] }
  0x61   :  { %v3457_v11 = vcombine.high %v159_v5, %v163_v6  ;;  %v3456_v18 = vcombine.low %v159_v5, %v163_v6  ;;  %v102_v57 = vld [vmem:[#allocation5 + $0x10] sm:$0xff]  ;;  %v223_v6 = vld [vmem:[#allocation5 + $0x3d8] sm:$0xff] }
  0x62   :  { %v106_v59 = vld [vmem:[#allocation5 + $0x30] sm:$0xff] }
  0x63   :  { %927 = vmatpush2.bf16.msra.mxu0 %v3514_v13  ;;  %970 = vmatpush2.bf16.msra.mxu1 %v3516_v14  ;;  %v154_v13 = vld [vmem:[#allocation5 + $0x1b0] sm:$0xff]  ;;  %v4494_v14 = vpack.c.bf16 %v96_v8, %v94_v2  ;;  %v3399_v5 = vcombine.high %v102_v57, %v106_v59 }
  0x64   :  { %928 = vmatprep.subr.bf16.mxu0 %v3507_v15  ;;  %971 = vmatprep.subr.bf16.mxu1 %v3509_v16  ;;  %v151_v15 = vld [vmem:[#allocation5 + $0x198] sm:$0xff]  ;;  %v3447_v19 = vcombine.high %v150_v12, %v154_v13  ;;  %v3446_v25 = vcombine.low %v150_v12, %v154_v13  ;;  %v222_v2 = vld [vmem:[#allocation5 + $0x3d0] sm:$0xff] }
  0x65   :  { %v155_v16 = vld [vmem:[#allocation5 + $0x1b8] sm:$0xff]  ;;  %v3519_v13 = vcombine.high %v222_v2, %v226_v3 }
  0x66   :  { %v3449_v20 = vcombine.high %v151_v15, %v155_v16  ;;  %v3448_v26 = vcombine.low %v151_v15, %v155_v16  ;;  %v215_v15 = vld [vmem:[#allocation5 + $0x398] sm:$0xff] }
  0x67   :  { %929 = vmatpush2.bf16.msra.mxu0 %v3506_v21  ;;  %972 = vmatpush2.bf16.msra.mxu1 %v3508_v22  ;;  %v142_v21 = vld [vmem:[#allocation5 + $0x150] sm:$0xff]  ;;  %v219_v16 = vld [vmem:[#allocation5 + $0x3b8] sm:$0xff] }
  0x68   :  { %930 = vmatprep.subr.bf16.mxu0 %v3499_v23  ;;  %973 = vmatprep.subr.bf16.mxu1 %v3501_v24  ;;  %v146_v22 = vld [vmem:[#allocation5 + $0x170] sm:$0xff]  ;;  %v143_v23 = vld [vmem:[#allocation5 + $0x158] sm:$0xff] }
  0x69   :  { %v147_v24 = vld [vmem:[#allocation5 + $0x178] sm:$0xff]  ;;  %v3439_v27 = vcombine.high %v142_v21, %v146_v22  ;;  %v3438_v33 = vcombine.low %v142_v21, %v146_v22 }
  0x6a   :  { %v3441_v28 = vcombine.high %v143_v23, %v147_v24  ;;  %v3440_v34 = vcombine.low %v143_v23, %v147_v24  ;;  %v207_v23 = vld [vmem:[#allocation5 + $0x358] sm:$0xff] }
  0x6b   :  { %931 = vmatpush2.bf16.msra.mxu0 %v3498_v29  ;;  %974 = vmatpush2.bf16.msra.mxu1 %v3500_v30  ;;  %v134_v29 = vld [vmem:[#allocation5 + $0x110] sm:$0xff]  ;;  %v211_v24 = vld [vmem:[#allocation5 + $0x378] sm:$0xff] }
  0x6c   :  { %932 = vmatprep.subr.bf16.mxu0 %v3491_v31  ;;  %975 = vmatprep.subr.bf16.mxu1 %v3493_v32  ;;  %v138_v30 = vld [vmem:[#allocation5 + $0x130] sm:$0xff]  ;;  %v135_v31 = vld [vmem:[#allocation5 + $0x118] sm:$0xff] }
  0x6d   :  { %v139_v32 = vld [vmem:[#allocation5 + $0x138] sm:$0xff]  ;;  %v3431_v35 = vcombine.high %v134_v29, %v138_v30  ;;  %v3430_v41 = vcombine.low %v134_v29, %v138_v30  ;;  %v3512_v29 = vcombine.low %v215_v15, %v219_v16 }
  0x6e   :  { %v3433_v36 = vcombine.high %v135_v31, %v139_v32  ;;  %v3432_v42 = vcombine.low %v135_v31, %v139_v32  ;;  %v199_v31 = vld [vmem:[#allocation5 + $0x318] sm:$0xff] }
  0x6f   :  { %933 = vmatpush2.bf16.msra.mxu0 %v3490_v37  ;;  %976 = vmatpush2.bf16.msra.mxu1 %v3492_v38  ;;  %v126_v37 = vld [vmem:[#allocation5 + $0xd0] sm:$0xff]  ;;  %v203_v32 = vld [vmem:[#allocation5 + $0x338] sm:$0xff] }
  0x70   :  { %934 = vmatprep.subr.bf16.mxu0 %v3483_v39  ;;  %977 = vmatprep.subr.bf16.mxu1 %v3485_v40  ;;  %v130_v38 = vld [vmem:[#allocation5 + $0xf0] sm:$0xff]  ;;  %v127_v39 = vld [vmem:[#allocation5 + $0xd8] sm:$0xff] }
  0x71   :  { %v131_v40 = vld [vmem:[#allocation5 + $0xf8] sm:$0xff]  ;;  %v3423_v43 = vcombine.high %v126_v37, %v130_v38 }
  0x72   :  { %v3424_v51 = vcombine.low %v127_v39, %v131_v40 }
  0x73   :  { %935 = vmatpush2.bf16.msra.mxu0 %v3482_v45  ;;  %978 = vmatpush2.bf16.msra.mxu1 %v3484_v46  ;;  %v122_v45 = vld [vmem:[#allocation5 + $0xb0] sm:$0xff]  ;;  %v119_v46 = vld [vmem:[#allocation5 + $0x98] sm:$0xff] }
  0x74   :  { %936 = vmatprep.subr.bf16.mxu0 %v3475_v47  ;;  %979 = vmatprep.subr.bf16.mxu1 %v3477_v48  ;;  %v123_v47 = vld [vmem:[#allocation5 + $0xb8] sm:$0xff]  ;;  %v3422_v48 = vcombine.low %v126_v37, %v130_v38  ;;  %v3415_v52 = vcombine.high %v118_v44, %v122_v45  ;;  %v3504_v37 = vcombine.low %v207_v23, %v211_v24 }
  0x75   :  { %v3416_v60 = vcombine.low %v119_v46, %v123_v47 }
  0x77   :  { %937 = vmatpush2.bf16.msra.mxu0 %v3474_v53  ;;  %980 = vmatpush2.bf16.msra.mxu1 %v3476_v54  ;;  %v111_v53 = vld [vmem:[#allocation5 + $0x58] sm:$0xff] }
  0x78   :  { %938 = vmatprep.subr.bf16.mxu0 %v3467_v55  ;;  %981 = vmatprep.subr.bf16.mxu1 %v3469_v56  ;;  %v115_v54 = vld [vmem:[#allocation5 + $0x78] sm:$0xff]  ;;  %v3417_v55 = vcombine.high %v119_v46, %v123_v47  ;;  %v3414_v56 = vcombine.low %v118_v44, %v122_v45  ;;  %v186_v44 = vld [vmem:[#allocation5 + $0x2b0] sm:$0xff] }
  0x79   :  { %v3408_v4 = vcombine.low %v111_v53, %v115_v54  ;;  %v183_v46 = vld [vmem:[#allocation5 + $0x298] sm:$0xff] }
  0x7a   :  { %v187_v47 = vld [vmem:[#allocation5 + $0x2b8] sm:$0xff] }
  0x7b   :  { %939 = vmatpush2.bf16.msra.mxu0 %v3466_v62  ;;  %982 = vmatpush2.bf16.msra.mxu1 %v3468_v63  ;;  %v103_v62 = vld [vmem:[#allocation5 + $0x18] sm:$0xff] }
  0x7c   :  { %940 = vmatprep.subr.bf16.mxu0 %v3459_v0  ;;  %983 = vmatprep.subr.bf16.mxu1 %v3461_v1  ;;  %v107_v63 = vld [vmem:[#allocation5 + $0x38] sm:$0xff]  ;;  %v3409_v0 = vcombine.high %v111_v53, %v115_v54  ;;  %v3406_v1 = vcombine.low %v110_v49, %v114_v50  ;;  %v174_v50 = vld [vmem:[#allocation5 + $0x250] sm:$0xff] }
  0x7d   :  { %v3401_v8 = vcombine.high %v103_v62, %v107_v63  ;;  %v3400_v12 = vcombine.low %v103_v62, %v107_v63  ;;  %v175_v54 = vld [vmem:[#allocation5 + $0x258] sm:$0xff] }
  0x7e   :  { %v167_v63 = vld [vmem:[#allocation5 + $0x218] sm:$0xff] }
  0x7f   :  { %941 = vmatpush2.bf16.msra.mxu0 %v3458_v7  ;;  %984 = vmatpush2.bf16.msra.mxu1 %v3460_v9  ;;  %v227_v7 = vld [vmem:[#allocation5 + $0x3f8] sm:$0xff]  ;;  %v3398_v9 = vcombine.low %v102_v57, %v106_v59  ;;  %v166_v59 = vld [vmem:[#allocation5 + $0x210] sm:$0xff] }
  0x80   :  { %996 = vmatprep.subr.bf16.mxu0 %v3455_v10  ;;  %1039 = vmatprep.subr.bf16.mxu1 %v3457_v11  ;;  %v214_v10 = vld [vmem:[#allocation5 + $0x390] sm:$0xff]  ;;  %v3520_v21 = vcombine.low %v223_v6, %v227_v7 }
  0x81   :  { %v218_v11 = vld [vmem:[#allocation5 + $0x3b0] sm:$0xff] }
  0x82   :  { %943 = vmatmul.mubr.bf16.vlgmr.msra.gmra.mxu0 %v4494_v14  ;;  %986 = vmatmul.mubr.bf16.vlgmr.msra.gmra.mxu1 %v4494_v14  ;;  %v3511_v22 = vcombine.high %v214_v10, %v218_v11 }
  0x83   :  { %997 = vmatpush1.bf16.msra.mxu0 %v3454_v17  ;;  %1040 = vmatpush1.bf16.msra.mxu1 %v3456_v18  ;;  %v3521_v17 = vcombine.high %v223_v6, %v227_v7  ;;  %v3518_v18 = vcombine.low %v222_v2, %v226_v3  ;;  %v3878_v6 = vld [vmem:[#allocation8 + $0xe4] ss:$16 sps:$4 sm:$0xff]  }
  0x84   :  { %998 = vmatprep.subr.bf16.mxu0 %v3447_v19  ;;  %1041 = vmatprep.subr.bf16.mxu1 %v3449_v20  ;;  %v206_v19 = vld [vmem:[#allocation5 + $0x350] sm:$0xff] }
  0x85   :  { %1028 = vmatprep.mubr.bf16.mxu0 %v4490_v58  ;;  %1071 = vmatprep.mubr.bf16.mxu1 %v4490_v58  ;;  %v3425_v58 = vcombine.high %v127_v39, %v131_v40  ;;  %v210_v20 = vld [vmem:[#allocation5 + $0x370] sm:$0xff]  ;;  %v191_v39 = vld [vmem:[#allocation5 + $0x2d8] sm:$0xff] }
  0x86   :  { %v3503_v30 = vcombine.high %v206_v19, %v210_v20  ;;  %v195_v40 = vld [vmem:[#allocation5 + $0x2f8] sm:$0xff] }
  0x87   :  { %999 = vmatpush1.bf16.msra.mxu0 %v3446_v25  ;;  %1042 = vmatpush1.bf16.msra.mxu1 %v3448_v26  ;;  %v3513_v25 = vcombine.high %v215_v15, %v219_v16  ;;  %v3510_v26 = vcombine.low %v214_v10, %v218_v11  ;;  %v3876_v10 = vld [vmem:[#allocation8 + $0xe0] ss:$16 sps:$4 sm:$0xff]  }
  0x88   :  { %1000 = vmatprep.subr.bf16.mxu0 %v3439_v27  ;;  %1043 = vmatprep.subr.bf16.mxu1 %v3441_v28  ;;  %v198_v27 = vld [vmem:[#allocation5 + $0x310] sm:$0xff]  ;;  %v3879_v11 = vld [vmem:[#allocation8 + $0x2e0] ss:$16 sps:$4 sm:$0xff]  }
  0x89   :  { %v202_v28 = vld [vmem:[#allocation5 + $0x330] sm:$0xff]  ;;  %v3882_v15 = vld [vmem:[#allocation8 + $0xc0] ss:$16 sps:$4 sm:$0xff]  }
  0x8a   :  { %v3495_v38 = vcombine.high %v198_v27, %v202_v28  ;;  %v3885_v16 = vld [vmem:[#allocation8 + $0x2c0] ss:$16 sps:$4 sm:$0xff]  }
  0x8b   :  { %1001 = vmatpush1.bf16.msra.mxu0 %v3438_v33  ;;  %1044 = vmatpush1.bf16.msra.mxu1 %v3440_v34  ;;  %v3505_v33 = vcombine.high %v207_v23, %v211_v24  ;;  %v3502_v34 = vcombine.low %v206_v19, %v210_v20  ;;  %v3888_v19 = vld [vmem:[#allocation8 + $0xa0] ss:$16 sps:$4 sm:$0xff]  }
  0x8c   :  { %1002 = vmatprep.subr.bf16.mxu0 %v3431_v35  ;;  %1045 = vmatprep.subr.bf16.mxu1 %v3433_v36  ;;  %v190_v35 = vld [vmem:[#allocation5 + $0x2d0] sm:$0xff]  ;;  %v3891_v20 = vld [vmem:[#allocation8 + $0x2a0] ss:$16 sps:$4 sm:$0xff]  }
  0x8d   :  { %v194_v36 = vld [vmem:[#allocation5 + $0x2f0] sm:$0xff]  ;;  %v3894_v23 = vld [vmem:[#allocation8 + $0x80] ss:$16 sps:$4 sm:$0xff]  }
  0x8e   :  { %v3487_v45 = vcombine.high %v190_v35, %v194_v36  ;;  %v3486_v49 = vcombine.low %v190_v35, %v194_v36  ;;  %v3897_v24 = vld [vmem:[#allocation8 + $0x280] ss:$16 sps:$4 sm:$0xff]   ;;  %v3920_v36 = vld [vmem:[#allocation8 + $0x4] ss:$16 sps:$4 sm:$0xff]  }
  0x8f   :  { %1003 = vmatpush1.bf16.msra.mxu0 %v3430_v41  ;;  %1046 = vmatpush1.bf16.msra.mxu1 %v3432_v42  ;;  %v3497_v41 = vcombine.high %v199_v31, %v203_v32  ;;  %v3494_v42 = vcombine.low %v198_v27, %v202_v28  ;;  %v3903_v27 = vld [vmem:[#allocation8 + $0x260] ss:$16 sps:$4 sm:$0xff]   ;;  %v3908_v28 = vld [vmem:[#allocation8 + $0x44] ss:$16 sps:$4 sm:$0xff]  }
  0x90   :  { %1004 = vmatprep.subr.bf16.mxu0 %v3423_v43  ;;  %1047 = vmatprep.subr.bf16.mxu1 %v3425_v58  ;;  %v182_v43 = vld [vmem:[#allocation5 + $0x290] sm:$0xff]  ;;  %v3496_v58 = vcombine.low %v199_v31, %v203_v32  ;;  %v3909_v31 = vld [vmem:[#allocation8 + $0x240] ss:$16 sps:$4 sm:$0xff]   ;;  %v3914_v32 = vld [vmem:[#allocation8 + $0x24] ss:$16 sps:$4 sm:$0xff]  }
  0x91   :  { %v3479_v53 = vcombine.high %v182_v43, %v186_v44  ;;  %v3478_v57 = vcombine.low %v182_v43, %v186_v44  ;;  %v3915_v35 = vld [vmem:[#allocation8 + $0x220] ss:$16 sps:$4 sm:$0xff]   ;;  %v3932_v44 = vld [vmem:[#allocation8 + $0x1c4] ss:$16 sps:$4 sm:$0xff]  }
  0x92   :  { %v3927_v43 = vld [vmem:[#allocation8 + $0x3e0] ss:$16 sps:$4 sm:$0xff]  }
  0x93   :  { %1005 = vmatpush1.bf16.msra.mxu0 %v3422_v48  ;;  %1048 = vmatpush1.bf16.msra.mxu1 %v3424_v51  ;;  %v3489_v48 = vcombine.high %v191_v39, %v195_v40  ;;  %v178_v51 = vld [vmem:[#allocation5 + $0x270] sm:$0xff] }
  0x94   :  { %1006 = vmatprep.subr.bf16.mxu0 %v3415_v52  ;;  %1049 = vmatprep.subr.bf16.mxu1 %v3417_v55  ;;  %v3488_v52 = vcombine.low %v191_v39, %v195_v40  ;;  %v179_v55 = vld [vmem:[#allocation5 + $0x278] sm:$0xff]  ;;  %v3471_v62 = vcombine.high %v174_v50, %v178_v51  ;;  %v3470_v2 = vcombine.low %v174_v50, %v178_v51 }
  0x95   :  { %v3472_v3 = vcombine.low %v175_v54, %v179_v55  ;;  %v3921_v39 = vld [vmem:[#allocation8 + $0x200] ss:$16 sps:$4 sm:$0xff]   ;;  %v3926_v40 = vld [vmem:[#allocation8 + $0x1e4] ss:$16 sps:$4 sm:$0xff]  }
  0x96   :  { %v3939_v50 = vld [vmem:[#allocation8 + $0x3a0] ss:$16 sps:$4 sm:$0xff]   ;;  %v3944_v51 = vld [vmem:[#allocation8 + $0x184] ss:$16 sps:$4 sm:$0xff]  }
  0x97   :  { %1007 = vmatpush1.bf16.msra.mxu0 %v3414_v56  ;;  %1050 = vmatpush1.bf16.msra.mxu1 %v3416_v60  ;;  %v3481_v56 = vcombine.high %v183_v46, %v187_v47  ;;  %v170_v60 = vld [vmem:[#allocation5 + $0x230] sm:$0xff] }
  0x98   :  { %1008 = vmatprep.subr.bf16.mxu0 %v3407_v61  ;;  %1051 = vmatprep.subr.bf16.mxu1 %v3409_v0  ;;  %v3480_v61 = vcombine.low %v183_v46, %v187_v47  ;;  %v171_v0 = vld [vmem:[#allocation5 + $0x238] sm:$0xff]  ;;  %v3462_v7 = vcombine.low %v166_v59, %v170_v60 }
  0x99   :  { %v3933_v46 = vld [vmem:[#allocation8 + $0x3c0] ss:$16 sps:$4 sm:$0xff]   ;;  %v3938_v47 = vld [vmem:[#allocation8 + $0x1a4] ss:$16 sps:$4 sm:$0xff]  }
  0x9b   :  { %1009 = vmatpush1.bf16.msra.mxu0 %v3406_v1  ;;  %1052 = vmatpush1.bf16.msra.mxu1 %v3408_v4  ;;  %v3473_v1 = vcombine.high %v175_v54, %v179_v55  ;;  %v3463_v4 = vcombine.high %v166_v59, %v170_v60  ;;  %v3945_v54 = vld [vmem:[#allocation8 + $0x380] ss:$16 sps:$4 sm:$0xff]   ;;  %v3950_v55 = vld [vmem:[#allocation8 + $0x164] ss:$16 sps:$4 sm:$0xff]  }
  0x9c   :  { %1010 = vmatprep.subr.bf16.mxu0 %v3399_v5  ;;  %1053 = vmatprep.subr.bf16.mxu1 %v3401_v8  ;;  %v3465_v5 = vcombine.high %v167_v63, %v171_v0  ;;  %v3881_v8 = vld [vmem:[#allocation8 + $0x2e4] ss:$16 sps:$4 sm:$0xff]   ;;  %v3951_v59 = vld [vmem:[#allocation8 + $0x360] ss:$16 sps:$4 sm:$0xff]  }
  0x9d   :  { %v3956_v60 = vld [vmem:[#allocation8 + $0x144] ss:$16 sps:$4 sm:$0xff]  }
  0x9f   :  { %1011 = vmatpush1.bf16.msra.mxu0 %v3398_v9  ;;  %1054 = vmatpush1.bf16.msra.mxu1 %v3400_v12  ;;  %v3464_v9 = vcombine.low %v167_v63, %v171_v0  ;;  %v3884_v12 = vld [vmem:[#allocation8 + $0xc4] ss:$16 sps:$4 sm:$0xff]   ;;  %v3957_v63 = vld [vmem:[#allocation8 + $0x340] ss:$16 sps:$4 sm:$0xff]  }
  0xa0   :  { %1012 = vmatprep.subr.bf16.mxu0 %v3519_v13  ;;  %1055 = vmatprep.subr.bf16.mxu1 %v3521_v17  ;;  %v3887_v13 = vld [vmem:[#allocation8 + $0x2c4] ss:$16 sps:$4 sm:$0xff]  }
  0xa1   :  { %v3890_v17 = vld [vmem:[#allocation8 + $0xa4] ss:$16 sps:$4 sm:$0xff]  }
  0xa2   :  { %v3962_v0 = vld [vmem:[#allocation8 + $0x124] ss:$16 sps:$4 sm:$0xff]  }
  0xa3   :  { %1013 = vmatpush2.bf16.msra.mxu0 %v3518_v18  ;;  %1056 = vmatpush2.bf16.msra.mxu1 %v3520_v21  ;;  %v3893_v18 = vld [vmem:[#allocation8 + $0x2a4] ss:$16 sps:$4 sm:$0xff]  }
  0xa4   :  { %1014 = vmatprep.subr.bf16.mxu0 %v3511_v22  ;;  %1057 = vmatprep.subr.bf16.mxu1 %v3513_v25  ;;  %v3896_v21 = vld [vmem:[#allocation8 + $0x84] ss:$16 sps:$4 sm:$0xff]  }
  0xa5   :  { %v3899_v22 = vld [vmem:[#allocation8 + $0x284] ss:$16 sps:$4 sm:$0xff]  }
  0xa6   :  { %v3902_v25 = vld [vmem:[#allocation8 + $0x64] ss:$16 sps:$4 sm:$0xff]  }
  0xa7   :  { %1015 = vmatpush2.bf16.msra.mxu0 %v3510_v26  ;;  %1058 = vmatpush2.bf16.msra.mxu1 %v3512_v29  ;;  %v3905_v26 = vld [vmem:[#allocation8 + $0x264] ss:$16 sps:$4 sm:$0xff]  }
  0xa8   :  { %1016 = vmatprep.subr.bf16.mxu0 %v3503_v30  ;;  %1059 = vmatprep.subr.bf16.mxu1 %v3505_v33  ;;  %v3911_v29 = vld [vmem:[#allocation8 + $0x244] ss:$16 sps:$4 sm:$0xff]   ;;  %v3906_v30 = vld [vmem:[#allocation8 + $0x40] ss:$16 sps:$4 sm:$0xff]  }
  0xa9   :  { %v3917_v33 = vld [vmem:[#allocation8 + $0x224] ss:$16 sps:$4 sm:$0xff]  }
  0xab   :  { %1017 = vmatpush2.bf16.msra.mxu0 %v3502_v34  ;;  %1060 = vmatpush2.bf16.msra.mxu1 %v3504_v37  ;;  %v3912_v34 = vld [vmem:[#allocation8 + $0x20] ss:$16 sps:$4 sm:$0xff]   ;;  %v3923_v37 = vld [vmem:[#allocation8 + $0x204] ss:$16 sps:$4 sm:$0xff]  }
  0xac   :  { %1018 = vmatprep.subr.bf16.mxu0 %v3495_v38  ;;  %1061 = vmatprep.subr.bf16.mxu1 %v3497_v41  ;;  %v3918_v38 = vld [vmem:[#allocation8] ss:$16 sps:$4 sm:$0xff]   ;;  %v3929_v41 = vld [vmem:[#allocation8 + $0x3e4] ss:$16 sps:$4 sm:$0xff]  }
  0xaf   :  { %1019 = vmatpush2.bf16.msra.mxu0 %v3494_v42  ;;  %1062 = vmatpush2.bf16.msra.mxu1 %v3496_v58  ;;  %v3924_v42 = vld [vmem:[#allocation8 + $0x1e0] ss:$16 sps:$4 sm:$0xff]   ;;  %v3935_v58 = vld [vmem:[#allocation8 + $0x3c4] ss:$16 sps:$4 sm:$0xff]  }
  0xb0   :  { %1020 = vmatprep.subr.bf16.mxu0 %v3487_v45  ;;  %1063 = vmatprep.subr.bf16.mxu1 %v3489_v48  ;;  %v3930_v45 = vld [vmem:[#allocation8 + $0x1c0] ss:$16 sps:$4 sm:$0xff]   ;;  %v3941_v48 = vld [vmem:[#allocation8 + $0x3a4] ss:$16 sps:$4 sm:$0xff]  }
  0xb3   :  { %1021 = vmatpush2.bf16.msra.mxu0 %v3486_v49  ;;  %1064 = vmatpush2.bf16.msra.mxu1 %v3488_v52  ;;  %v3936_v49 = vld [vmem:[#allocation8 + $0x1a0] ss:$16 sps:$4 sm:$0xff]   ;;  %v3947_v52 = vld [vmem:[#allocation8 + $0x384] ss:$16 sps:$4 sm:$0xff]  }
  0xb4   :  { %1022 = vmatprep.subr.bf16.mxu0 %v3479_v53  ;;  %1065 = vmatprep.subr.bf16.mxu1 %v3481_v56  ;;  %v3942_v53 = vld [vmem:[#allocation8 + $0x180] ss:$16 sps:$4 sm:$0xff]   ;;  %v3953_v56 = vld [vmem:[#allocation8 + $0x364] ss:$16 sps:$4 sm:$0xff]  }
  0xb7   :  { %1023 = vmatpush2.bf16.msra.mxu0 %v3478_v57  ;;  %1066 = vmatpush2.bf16.msra.mxu1 %v3480_v61  ;;  %v3948_v57 = vld [vmem:[#allocation8 + $0x160] ss:$16 sps:$4 sm:$0xff]   ;;  %v3959_v61 = vld [vmem:[#allocation8 + $0x344] ss:$16 sps:$4 sm:$0xff]  }
  0xb8   :  { %1024 = vmatprep.subr.bf16.mxu0 %v3471_v62  ;;  %1067 = vmatprep.subr.bf16.mxu1 %v3473_v1  ;;  %v3954_v62 = vld [vmem:[#allocation8 + $0x140] ss:$16 sps:$4 sm:$0xff]   ;;  %v3965_v1 = vld [vmem:[#allocation8 + $0x324] ss:$16 sps:$4 sm:$0xff]  }
  0xbb   :  { %1025 = vmatpush2.bf16.msra.mxu0 %v3470_v2  ;;  %1068 = vmatpush2.bf16.msra.mxu1 %v3472_v3  ;;  %v3960_v2 = vld [vmem:[#allocation8 + $0x120] ss:$16 sps:$4 sm:$0xff]  }
  0xbc   :  { %1026 = vmatprep.subr.bf16.mxu0 %v3463_v4  ;;  %1069 = vmatprep.subr.bf16.mxu1 %v3465_v5  ;;  %v3963_v3 = vld [vmem:[#allocation8 + $0x320] ss:$16 sps:$4 sm:$0xff]   ;;  %v3968_v4 = vld [vmem:[#allocation8 + $0x104] ss:$16 sps:$4 sm:$0xff]  }
  0xbd   :  { %v3971_v5 = vld [vmem:[#allocation8 + $0x304] ss:$16 sps:$4 sm:$0xff]  }
  0xbf   :  { %1027 = vmatpush2.bf16.msra.mxu0 %v3462_v7  ;;  %1070 = vmatpush2.bf16.msra.mxu1 %v3464_v9  ;;  %v3969_v7 = vld [vmem:[#allocation8 + $0x300] ss:$16 sps:$4 sm:$0xff]   ;;  %v3977_v9 = vld [vmem:[#allocation8 + $0x6e4] ss:$16 sps:$4 sm:$0xff]  }
  0xc0   :  { %2664 = vmatprep.subr.bf16.mxu0 %v3878_v6  ;;  %2707 = vmatprep.subr.bf16.mxu1 %v3881_v8  ;;  %v3966_v6 = vld [vmem:[#allocation8 + $0x100] ss:$16 sps:$4 sm:$0xff]   ;;  %v3974_v8 = vld [vmem:[#allocation8 + $0x4e4] ss:$16 sps:$4 sm:$0xff]  }
  0xc2   :  { %1029 = vmatmul.mubr.bf16.vlgmr.msra.gmra.mxu0 %v4494_v14  ;;  %1072 = vmatmul.mubr.bf16.vlgmr.msra.gmra.mxu1 %v4494_v14  ;;  %v3900_v14 = vld [vmem:[#allocation8 + $0x60] ss:$16 sps:$4 sm:$0xff]  }
  0xc3   :  { %2665 = vmatpush1.bf16.msra.mxu0 %v3876_v10  ;;  %2708 = vmatpush1.bf16.msra.mxu1 %v3879_v11  ;;  %v230_v10 = vlaneseq }
  0xc4   :  { %2666 = vmatprep.subr.bf16.mxu0 %v3884_v12  ;;  %2709 = vmatprep.subr.bf16.mxu1 %v3887_v13 }
  0xc5   :  { %v4502_v11 = vshrl.u32 %v230_v10, 7  ;;  %v4011_v10 = vld [vmem:[#allocation8 + $0x620] ss:$16 sps:$4 sm:$0xff]  }
  0xc7   :  { %2667 = vmatpush1.bf16.msra.mxu0 %v3882_v15  ;;  %2710 = vmatpush1.bf16.msra.mxu1 %v3885_v16  ;;  %v236_v12 = vsub.s32 1, %v4502_v11  ;;  %v232_v13 = vsub.s32 0, %v4502_v11  ;;  %v244_v15 = vsub.s32 3, %v4502_v11  ;;  %v4507_v16 = vld [vmem:[#allocation7] sm:$0xff] }
  0xc8   :  { %2668 = vmatprep.subr.bf16.mxu0 %v3890_v17  ;;  %2711 = vmatprep.subr.bf16.mxu1 %v3893_v18  ;;  %v240_v17 = vsub.s32 2, %v4502_v11 }
  0xcb   :  { %2669 = vmatpush1.bf16.msra.mxu0 %v3888_v19  ;;  %2712 = vmatpush1.bf16.msra.mxu1 %v3891_v20  ;;  %v237_v20 = vrot.slane %v4507_v16, %v236_v12 }
  0xcc   :  { %2670 = vmatprep.subr.bf16.mxu0 %v3896_v21  ;;  %2713 = vmatprep.subr.bf16.mxu1 %v3899_v22  ;;  %v233_v21 = vrot.slane %v4507_v16, %v232_v13 }
  0xcf   :  { %2671 = vmatpush1.bf16.msra.mxu0 %v3894_v23  ;;  %2714 = vmatpush1.bf16.msra.mxu1 %v3897_v24  ;;  %v245_v23 = vrot.slane %v4507_v16, %v244_v15  ;;  %v241_v24 = vrot.slane %v4507_v16, %v240_v17 }
  0xd0   :  { %2672 = vmatprep.subr.bf16.mxu0 %v3902_v25  ;;  %2715 = vmatprep.subr.bf16.mxu1 %v3905_v26 }
  0xd3   :  { %2673 = vmatpush1.bf16.msra.mxu0 %v3900_v14  ;;  %2716 = vmatpush1.bf16.msra.mxu1 %v3903_v27 }
  0xd4   :  { %2674 = vmatprep.subr.bf16.mxu0 %v3908_v28  ;;  %2717 = vmatprep.subr.bf16.mxu1 %v3911_v29 }
  0xd7   :  { %2675 = vmatpush1.bf16.msra.mxu0 %v3906_v30  ;;  %2718 = vmatpush1.bf16.msra.mxu1 %v3909_v31 }
  0xd8   :  { %2676 = vmatprep.subr.bf16.mxu0 %v3914_v32  ;;  %2719 = vmatprep.subr.bf16.mxu1 %v3917_v33 }
  0xdb   :  { %2677 = vmatpush1.bf16.msra.mxu0 %v3912_v34  ;;  %2720 = vmatpush1.bf16.msra.mxu1 %v3915_v35 }
  0xdc   :  { %2678 = vmatprep.subr.bf16.mxu0 %v3920_v36  ;;  %2721 = vmatprep.subr.bf16.mxu1 %v3923_v37 }
  0xdf   :  { %2679 = vmatpush1.bf16.msra.mxu0 %v3918_v38  ;;  %2722 = vmatpush1.bf16.msra.mxu1 %v3921_v39 }
  0xe0   :  { %2680 = vmatprep.subr.bf16.mxu0 %v3926_v40  ;;  %2723 = vmatprep.subr.bf16.mxu1 %v3929_v41 }
  0xe3   :  { %2681 = vmatpush2.bf16.msra.mxu0 %v3924_v42  ;;  %2724 = vmatpush2.bf16.msra.mxu1 %v3927_v43 }
  0xe4   :  { %2682 = vmatprep.subr.bf16.mxu0 %v3932_v44  ;;  %2725 = vmatprep.subr.bf16.mxu1 %v3935_v58 }
  0xe7   :  { %2683 = vmatpush2.bf16.msra.mxu0 %v3930_v45  ;;  %2726 = vmatpush2.bf16.msra.mxu1 %v3933_v46  ;;  %v3972_v45 = vld [vmem:[#allocation8 + $0x4e0] ss:$16 sps:$4 sm:$0xff]  }
  0xe8   :  { %2684 = vmatprep.subr.bf16.mxu0 %v3938_v47  ;;  %2727 = vmatprep.subr.bf16.mxu1 %v3941_v48  ;;  %v3975_v48 = vld [vmem:[#allocation8 + $0x6e0] ss:$16 sps:$4 sm:$0xff]  }
  0xeb   :  { %2685 = vmatpush2.bf16.msra.mxu0 %v3936_v49  ;;  %2728 = vmatpush2.bf16.msra.mxu1 %v3939_v50  ;;  %v3980_v49 = vld [vmem:[#allocation8 + $0x4c4] ss:$16 sps:$4 sm:$0xff]  }
  0xec   :  { %2686 = vmatprep.subr.bf16.mxu0 %v3944_v51  ;;  %2729 = vmatprep.subr.bf16.mxu1 %v3947_v52  ;;  %v3983_v51 = vld [vmem:[#allocation8 + $0x6c4] ss:$16 sps:$4 sm:$0xff]   ;;  %v3978_v52 = vld [vmem:[#allocation8 + $0x4c0] ss:$16 sps:$4 sm:$0xff]  }
  0xef   :  { %2687 = vmatpush2.bf16.msra.mxu0 %v3942_v53  ;;  %2730 = vmatpush2.bf16.msra.mxu1 %v3945_v54  ;;  %v3981_v53 = vld [vmem:[#allocation8 + $0x6c0] ss:$16 sps:$4 sm:$0xff]   ;;  %v3986_v54 = vld [vmem:[#allocation8 + $0x4a4] ss:$16 sps:$4 sm:$0xff]  }
  0xf0   :  { %2688 = vmatprep.subr.bf16.mxu0 %v3950_v55  ;;  %2731 = vmatprep.subr.bf16.mxu1 %v3953_v56  ;;  %v3989_v55 = vld [vmem:[#allocation8 + $0x6a4] ss:$16 sps:$4 sm:$0xff]   ;;  %v3984_v56 = vld [vmem:[#allocation8 + $0x4a0] ss:$16 sps:$4 sm:$0xff]  }
  0xf3   :  { %2689 = vmatpush2.bf16.msra.mxu0 %v3948_v57  ;;  %2732 = vmatpush2.bf16.msra.mxu1 %v3951_v59  ;;  %v3987_v57 = vld [vmem:[#allocation8 + $0x6a0] ss:$16 sps:$4 sm:$0xff]   ;;  %v3992_v59 = vld [vmem:[#allocation8 + $0x484] ss:$16 sps:$4 sm:$0xff]  }
  0xf4   :  { %2690 = vmatprep.subr.bf16.mxu0 %v3956_v60  ;;  %2733 = vmatprep.subr.bf16.mxu1 %v3959_v61  ;;  %v3995_v60 = vld [vmem:[#allocation8 + $0x684] ss:$16 sps:$4 sm:$0xff]   ;;  %v3990_v61 = vld [vmem:[#allocation8 + $0x480] ss:$16 sps:$4 sm:$0xff]  }
  0xf7   :  { %2691 = vmatpush2.bf16.msra.mxu0 %v3954_v62  ;;  %2734 = vmatpush2.bf16.msra.mxu1 %v3957_v63  ;;  %v3993_v62 = vld [vmem:[#allocation8 + $0x680] ss:$16 sps:$4 sm:$0xff]   ;;  %v3998_v63 = vld [vmem:[#allocation8 + $0x464] ss:$16 sps:$4 sm:$0xff]  }
  0xf8   :  { %2692 = vmatprep.subr.bf16.mxu0 %v3962_v0  ;;  %2735 = vmatprep.subr.bf16.mxu1 %v3965_v1  ;;  %v4001_v0 = vld [vmem:[#allocation8 + $0x664] ss:$16 sps:$4 sm:$0xff]   ;;  %v3996_v1 = vld [vmem:[#allocation8 + $0x460] ss:$16 sps:$4 sm:$0xff]  }
  0xfb   :  { %2693 = vmatpush2.bf16.msra.mxu0 %v3960_v2  ;;  %2736 = vmatpush2.bf16.msra.mxu1 %v3963_v3  ;;  %v3999_v2 = vld [vmem:[#allocation8 + $0x660] ss:$16 sps:$4 sm:$0xff]   ;;  %v4004_v3 = vld [vmem:[#allocation8 + $0x444] ss:$16 sps:$4 sm:$0xff]  }
  0xfc   :  { %2694 = vmatprep.subr.bf16.mxu0 %v3968_v4  ;;  %2737 = vmatprep.subr.bf16.mxu1 %v3971_v5  ;;  %v4007_v4 = vld [vmem:[#allocation8 + $0x644] ss:$16 sps:$4 sm:$0xff]   ;;  %v4002_v5 = vld [vmem:[#allocation8 + $0x440] ss:$16 sps:$4 sm:$0xff]  }
  0xff   :  { %2695 = vmatpush2.bf16.msra.mxu0 %v3966_v6  ;;  %2738 = vmatpush2.bf16.msra.mxu1 %v3969_v7  ;;  %v4005_v6 = vld [vmem:[#allocation8 + $0x640] ss:$16 sps:$4 sm:$0xff]   ;;  %v4010_v7 = vld [vmem:[#allocation8 + $0x424] ss:$16 sps:$4 sm:$0xff]  }
 0x100   :  { %2750 = vmatprep.subr.bf16.mxu0 %v3974_v8  ;;  %2793 = vmatprep.subr.bf16.mxu1 %v3977_v9  ;;  %v4013_v8 = vld [vmem:[#allocation8 + $0x624] ss:$16 sps:$4 sm:$0xff]   ;;  %v4008_v9 = vld [vmem:[#allocation8 + $0x420] ss:$16 sps:$4 sm:$0xff]  }
 0x142   :  { %v944_v18 = vpop.f32.mrf.mxu0  ;;  %v987_v19 = vpop.f32.mrf.mxu1 }
 0x143   :  { %v945_v29 = vadd.f32 %v944_v18, %v233_v21  ;;  %v988_v33 = vadd.f32 %v987_v19, %v241_v24  ;;  %v4016_v18 = vld [vmem:[#allocation8 + $0x404] ss:$16 sps:$4 sm:$0xff]  }
 0x144   :  { %v946_v22 = vpop.f32.mrf.mxu0  ;;  %v989_v25 = vpop.f32.mrf.mxu1  ;;  %v4019_v19 = vld [vmem:[#allocation8 + $0x604] ss:$16 sps:$4 sm:$0xff]  }
 0x145   :  { %v947_v14 = vadd.f32 %v946_v22, %v237_v20  ;;  %v990_v30 = vadd.f32 %v989_v25, %v245_v23  ;;  %v1082_v41 = vmax.f32 %v945_v29, 0.0  ;;  %v1084_v44 = vmax.f32 %v988_v33, 0.0  ;;  %v4022_v22 = vld [vmem:[#allocation8 + $0x5e4] ss:$16 sps:$4 sm:$0xff]   ;;  %v4023_v25 = vld [vmem:[#allocation8 + $0x7e0] ss:$16 sps:$4 sm:$0xff]  }
 0x146   :  { %v948_v26 = vpop.f32.mrf.mxu0  ;;  %v991_v28 = vpop.f32.mrf.mxu1  ;;  %v4034_v29 = vld [vmem:[#allocation8 + $0x5a4] ss:$16 sps:$4 sm:$0xff]  }
 0x147   :  { %v949_v27 = vadd.f32 %v948_v26, %v233_v21  ;;  %v992_v31 = vadd.f32 %v991_v28, %v241_v24  ;;  %v1083_v38 = vmax.f32 %v947_v14, 0.0  ;;  %v1085_v42 = vmax.f32 %v990_v30, 0.0  ;;  %v4017_v21 = vld [vmem:[#allocation8 + $0x600] ss:$16 sps:$4 sm:$0xff]   ;;  %v4028_v26 = vld [vmem:[#allocation8 + $0x5c4] ss:$16 sps:$4 sm:$0xff]  }
 0x148   :  { %v950_v32 = vpop.f32.mrf.mxu0  ;;  %v993_v35 = vpop.f32.mrf.mxu1  ;;  %v4020_v24 = vld [vmem:[#allocation8 + $0x5e0] ss:$16 sps:$4 sm:$0xff]   ;;  %v4031_v14 = vld [vmem:[#allocation8 + $0x7c4] ss:$16 sps:$4 sm:$0xff]  }
 0x149   :  { %v951_v34 = vadd.f32 %v950_v32, %v237_v20  ;;  %v1090_v36 = vmax.f32 %v949_v27, 0.0  ;;  %v994_v37 = vadd.f32 %v993_v35, %v245_v23  ;;  %v1092_v39 = vmax.f32 %v992_v31, 0.0  ;;  %v4014_v20 = vld [vmem:[#allocation8 + $0x400] ss:$16 sps:$4 sm:$0xff]   ;;  %v4025_v23 = vld [vmem:[#allocation8 + $0x7e4] ss:$16 sps:$4 sm:$0xff]  }
 0x14a   :  { %v4026_v27 = vld [vmem:[#allocation8 + $0x5c0] ss:$16 sps:$4 sm:$0xff]   ;;  %v4037_v30 = vld [vmem:[#allocation8 + $0x7a4] ss:$16 sps:$4 sm:$0xff]  }
 0x14b   :  { %v1091_v40 = vmax.f32 %v951_v34, 0.0  ;;  %v1093_v43 = vmax.f32 %v994_v37, 0.0  ;;  %v4524_v46 = vpack.c.bf16 %v1090_v36, %v1082_v41  ;;  %v4528_v50 = vpack.c.bf16 %v1092_v39, %v1084_v44  ;;  %v4029_v28 = vld [vmem:[#allocation8 + $0x7c0] ss:$16 sps:$4 sm:$0xff]   ;;  %v4040_v33 = vld [vmem:[#allocation8 + $0x584] ss:$16 sps:$4 sm:$0xff]  }
 0x14c   :  { %v4032_v31 = vld [vmem:[#allocation8 + $0x5a0] ss:$16 sps:$4 sm:$0xff]   ;;  %v4043_v34 = vld [vmem:[#allocation8 + $0x784] ss:$16 sps:$4 sm:$0xff]   ;;  %v248_v44 = vsub.s32 4, %v4502_v11 }
 0x14d   :  { %v4522_v58 = vpack.c.bf16 %v1091_v40, %v1083_v38  ;;  %v4526_v47 = vpack.c.bf16 %v1093_v43, %v1085_v42  ;;  %v4035_v32 = vld [vmem:[#allocation8 + $0x7a0] ss:$16 sps:$4 sm:$0xff]   ;;  %v4046_v37 = vld [vmem:[#allocation8 + $0x564] ss:$16 sps:$4 sm:$0xff]   ;;  %v252_v43 = vsub.s32 5, %v4502_v11 }
 0x14e   :  { %v4038_v35 = vld [vmem:[#allocation8 + $0x580] ss:$16 sps:$4 sm:$0xff]   ;;  %v4049_v38 = vld [vmem:[#allocation8 + $0x764] ss:$16 sps:$4 sm:$0xff]  }
 0x14f   :  { %2696 = vmatprep.mubr.bf16.mxu0 %v4522_v58  ;;  %2739 = vmatprep.mubr.bf16.mxu1 %v4526_v47  ;;  %v4041_v36 = vld [vmem:[#allocation8 + $0x780] ss:$16 sps:$4 sm:$0xff]   ;;  %v4052_v41 = vld [vmem:[#allocation8 + $0x544] ss:$16 sps:$4 sm:$0xff]  }
 0x150   :  { %2697 = vmatmul.mubr.bf16.vlgmr.msra.gmra.mxu0 %v4524_v46  ;;  %2740 = vmatmul.mubr.bf16.vlgmr.msra.gmra.mxu1 %v4528_v50  ;;  %v4044_v39 = vld [vmem:[#allocation8 + $0x560] ss:$16 sps:$4 sm:$0xff]   ;;  %v4055_v42 = vld [vmem:[#allocation8 + $0x744] ss:$16 sps:$4 sm:$0xff]  }
 0x151   :  { %2751 = vmatpush1.bf16.msra.mxu0 %v3972_v45  ;;  %2794 = vmatpush1.bf16.msra.mxu1 %v3975_v48  ;;  %v4047_v40 = vld [vmem:[#allocation8 + $0x760] ss:$16 sps:$4 sm:$0xff]   ;;  %v260_v45 = vsub.s32 7, %v4502_v11  ;;  %v256_v48 = vsub.s32 6, %v4502_v11 }
 0x152   :  { %2752 = vmatprep.subr.bf16.mxu0 %v3980_v49  ;;  %2795 = vmatprep.subr.bf16.mxu1 %v3983_v51  ;;  %v4050_v49 = vld [vmem:[#allocation8 + $0x540] ss:$16 sps:$4 sm:$0xff]  }
 0x155   :  { %2753 = vmatpush1.bf16.msra.mxu0 %v3978_v52  ;;  %2796 = vmatpush1.bf16.msra.mxu1 %v3981_v53  ;;  %v4053_v52 = vld [vmem:[#allocation8 + $0x740] ss:$16 sps:$4 sm:$0xff]   ;;  %v4058_v53 = vld [vmem:[#allocation8 + $0x524] ss:$16 sps:$4 sm:$0xff]  }
 0x156   :  { %2754 = vmatprep.subr.bf16.mxu0 %v3986_v54  ;;  %2797 = vmatprep.subr.bf16.mxu1 %v3989_v55  ;;  %v253_v55 = vrot.slane %v4507_v16, %v252_v43  ;;  %v4085_v43 = vld [vmem:[#allocation8 + $0x2ac] ss:$16 sps:$4 sm:$0xff]  }
 0x159   :  { %2755 = vmatpush1.bf16.msra.mxu0 %v3984_v56  ;;  %2798 = vmatpush1.bf16.msra.mxu1 %v3987_v57  ;;  %v4061_v56 = vld [vmem:[#allocation8 + $0x724] ss:$16 sps:$4 sm:$0xff]   ;;  %v249_v57 = vrot.slane %v4507_v16, %v248_v44  ;;  %v4080_v44 = vld [vmem:[#allocation8 + $0xa8] ss:$16 sps:$4 sm:$0xff]  }
 0x15a   :  { %2756 = vmatprep.subr.bf16.mxu0 %v3992_v59  ;;  %2799 = vmatprep.subr.bf16.mxu1 %v3995_v60  ;;  %v261_v60 = vrot.slane %v4507_v16, %v260_v45  ;;  %v4083_v45 = vld [vmem:[#allocation8 + $0x2a8] ss:$16 sps:$4 sm:$0xff]  }
 0x15d   :  { %2757 = vmatpush1.bf16.msra.mxu0 %v3990_v61  ;;  %2800 = vmatpush1.bf16.msra.mxu1 %v3993_v62  ;;  %v257_v61 = vrot.slane %v4507_v16, %v256_v48  ;;  %v4088_v48 = vld [vmem:[#allocation8 + $0x8c] ss:$16 sps:$4 sm:$0xff]  }
 0x15e   :  { %2758 = vmatprep.subr.bf16.mxu0 %v3998_v63  ;;  %2801 = vmatprep.subr.bf16.mxu1 %v4001_v0  ;;  %v4056_v63 = vld [vmem:[#allocation8 + $0x520] ss:$16 sps:$4 sm:$0xff]  }
 0x161   :  { %2759 = vmatpush1.bf16.msra.mxu0 %v3996_v1  ;;  %2802 = vmatpush1.bf16.msra.mxu1 %v3999_v2  ;;  %v4059_v1 = vld [vmem:[#allocation8 + $0x720] ss:$16 sps:$4 sm:$0xff]   ;;  %v4064_v2 = vld [vmem:[#allocation8 + $0x504] ss:$16 sps:$4 sm:$0xff]  }
 0x162   :  { %2760 = vmatprep.subr.bf16.mxu0 %v4004_v3  ;;  %2803 = vmatprep.subr.bf16.mxu1 %v4007_v4 }
 0x165   :  { %2761 = vmatpush1.bf16.msra.mxu0 %v4002_v5  ;;  %2804 = vmatpush1.bf16.msra.mxu1 %v4005_v6  ;;  %v4067_v6 = vld [vmem:[#allocation8 + $0x704] ss:$16 sps:$4 sm:$0xff]  }
 0x166   :  { %2762 = vmatprep.subr.bf16.mxu0 %v4010_v7  ;;  %2805 = vmatprep.subr.bf16.mxu1 %v4013_v8 }
 0x169   :  { %2763 = vmatpush1.bf16.msra.mxu0 %v4008_v9  ;;  %2806 = vmatpush1.bf16.msra.mxu1 %v4011_v10 }
 0x16a   :  { %2764 = vmatprep.subr.bf16.mxu0 %v4016_v18  ;;  %2807 = vmatprep.subr.bf16.mxu1 %v4019_v19 }
 0x16d   :  { %2765 = vmatpush1.bf16.msra.mxu0 %v4014_v20  ;;  %2808 = vmatpush1.bf16.msra.mxu1 %v4017_v21  ;;  %v4062_v20 = vld [vmem:[#allocation8 + $0x500] ss:$16 sps:$4 sm:$0xff]  }
 0x16e   :  { %2766 = vmatprep.subr.bf16.mxu0 %v4022_v22  ;;  %2809 = vmatprep.subr.bf16.mxu1 %v4025_v23  ;;  %v4065_v23 = vld [vmem:[#allocation8 + $0x700] ss:$16 sps:$4 sm:$0xff]  }
 0x171   :  { %2767 = vmatpush2.bf16.msra.mxu0 %v4020_v24  ;;  %2810 = vmatpush2.bf16.msra.mxu1 %v4023_v25  ;;  %v4070_v24 = vld [vmem:[#allocation8 + $0xec] ss:$16 sps:$4 sm:$0xff]  }
 0x172   :  { %2768 = vmatprep.subr.bf16.mxu0 %v4028_v26  ;;  %2811 = vmatprep.subr.bf16.mxu1 %v4031_v14 }
 0x175   :  { %2769 = vmatpush2.bf16.msra.mxu0 %v4026_v27  ;;  %2812 = vmatpush2.bf16.msra.mxu1 %v4029_v28  ;;  %v4073_v27 = vld [vmem:[#allocation8 + $0x2ec] ss:$16 sps:$4 sm:$0xff]  }
 0x176   :  { %2770 = vmatprep.subr.bf16.mxu0 %v4034_v29  ;;  %2813 = vmatprep.subr.bf16.mxu1 %v4037_v30 }
 0x179   :  { %2771 = vmatpush2.bf16.msra.mxu0 %v4032_v31  ;;  %2814 = vmatpush2.bf16.msra.mxu1 %v4035_v32 }
 0x17a   :  { %2772 = vmatprep.subr.bf16.mxu0 %v4040_v33  ;;  %2815 = vmatprep.subr.bf16.mxu1 %v4043_v34  ;;  %v4068_v33 = vld [vmem:[#allocation8 + $0xe8] ss:$16 sps:$4 sm:$0xff]  }
 0x17d   :  { %2773 = vmatpush2.bf16.msra.mxu0 %v4038_v35  ;;  %2816 = vmatpush2.bf16.msra.mxu1 %v4041_v36  ;;  %v4071_v36 = vld [vmem:[#allocation8 + $0x2e8] ss:$16 sps:$4 sm:$0xff]  }
 0x17e   :  { %2774 = vmatprep.subr.bf16.mxu0 %v4046_v37  ;;  %2817 = vmatprep.subr.bf16.mxu1 %v4049_v38  ;;  %v4076_v38 = vld [vmem:[#allocation8 + $0xcc] ss:$16 sps:$4 sm:$0xff]  }
 0x181   :  { %2775 = vmatpush2.bf16.msra.mxu0 %v4044_v39  ;;  %2818 = vmatpush2.bf16.msra.mxu1 %v4047_v40  ;;  %v4079_v39 = vld [vmem:[#allocation8 + $0x2cc] ss:$16 sps:$4 sm:$0xff]   ;;  %v4074_v40 = vld [vmem:[#allocation8 + $0xc8] ss:$16 sps:$4 sm:$0xff]  }
 0x182   :  { %v1030_v51 = vpop.f32.mrf.mxu0  ;;  %2776 = vmatprep.subr.bf16.mxu0 %v4052_v41  ;;  %v1073_v54 = vpop.f32.mrf.mxu1  ;;  %2819 = vmatprep.subr.bf16.mxu1 %v4055_v42  ;;  %v4077_v41 = vld [vmem:[#allocation8 + $0x2c8] ss:$16 sps:$4 sm:$0xff]   ;;  %v4082_v42 = vld [vmem:[#allocation8 + $0xac] ss:$16 sps:$4 sm:$0xff]  }
 0x183   :  { %v1031_v7 = vadd.f32 %v1030_v51, %v249_v57  ;;  %v1074_v18 = vadd.f32 %v1073_v54, %v257_v61  ;;  %v4086_v51 = vld [vmem:[#allocation8 + $0x88] ss:$16 sps:$4 sm:$0xff]  }
 0x184   :  { %v1032_v59 = vpop.f32.mrf.mxu0  ;;  %v1075_v62 = vpop.f32.mrf.mxu1  ;;  %v4095_v54 = vld [vmem:[#allocation8 + $0x268] ss:$16 sps:$4 sm:$0xff]  }
 0x185   :  { %2777 = vmatpush2.bf16.msra.mxu0 %v4050_v49  ;;  %2820 = vmatpush2.bf16.msra.mxu1 %v4053_v52  ;;  %v1033_v3 = vadd.f32 %v1032_v59, %v253_v55  ;;  %v1076_v8 = vadd.f32 %v1075_v62, %v261_v60  ;;  %v1086_v28 = vmax.f32 %v1031_v7, 0.0  ;;  %v1088_v31 = vmax.f32 %v1074_v18, 0.0  ;;  %v4091_v49 = vld [vmem:[#allocation8 + $0x28c] ss:$16 sps:$4 sm:$0xff]   ;;  %v4101_v59 = vld [vmem:[#allocation8 + $0x248] ss:$16 sps:$4 sm:$0xff]  }
 0x186   :  { %v1034_v0 = vpop.f32.mrf.mxu0  ;;  %2778 = vmatprep.subr.bf16.mxu0 %v4058_v53  ;;  %v1077_v5 = vpop.f32.mrf.mxu1  ;;  %2821 = vmatprep.subr.bf16.mxu1 %v4061_v56  ;;  %v4094_v52 = vld [vmem:[#allocation8 + $0x6c] ss:$16 sps:$4 sm:$0xff]   ;;  %v4104_v62 = vld [vmem:[#allocation8 + $0x28] ss:$16 sps:$4 sm:$0xff]  }
 0x187   :  { %v1035_v4 = vadd.f32 %v1034_v0, %v249_v57  ;;  %v1078_v9 = vadd.f32 %v1077_v5, %v257_v61  ;;  %v1087_v25 = vmax.f32 %v1033_v3, 0.0  ;;  %v1089_v29 = vmax.f32 %v1076_v8, 0.0  ;;  %v4097_v53 = vld [vmem:[#allocation8 + $0x26c] ss:$16 sps:$4 sm:$0xff]   ;;  %v4098_v57 = vld [vmem:[#allocation8 + $0x48] ss:$16 sps:$4 sm:$0xff]  }
 0x188   :  { %v1036_v10 = vpop.f32.mrf.mxu0  ;;  %v1079_v16 = vpop.f32.mrf.mxu1  ;;  %v4103_v56 = vld [vmem:[#allocation8 + $0x24c] ss:$16 sps:$4 sm:$0xff]   ;;  %v4113_v3 = vld [vmem:[#allocation8 + $0x208] ss:$16 sps:$4 sm:$0xff]  }
 0x189   :  { %v1037_v19 = vadd.f32 %v1036_v10, %v253_v55  ;;  %2779 = vmatpush2.bf16.msra.mxu0 %v4056_v63  ;;  %v1094_v21 = vmax.f32 %v1035_v4, 0.0  ;;  %v1080_v22 = vadd.f32 %v1079_v16, %v261_v60  ;;  %2822 = vmatpush2.bf16.msra.mxu1 %v4059_v1  ;;  %v1096_v26 = vmax.f32 %v1078_v9, 0.0  ;;  %v4100_v55 = vld [vmem:[#allocation8 + $0x4c] ss:$16 sps:$4 sm:$0xff]   ;;  %v4107_v63 = vld [vmem:[#allocation8 + $0x228] ss:$16 sps:$4 sm:$0xff]  }
 0x18a   :  { %2780 = vmatprep.subr.bf16.mxu0 %v4064_v2  ;;  %2823 = vmatprep.subr.bf16.mxu1 %v4067_v6  ;;  %v4106_v60 = vld [vmem:[#allocation8 + $0x2c] ss:$16 sps:$4 sm:$0xff]   ;;  %v4110_v2 = vld [vmem:[#allocation8 + $0x8] ss:$16 sps:$4 sm:$0xff]  }
 0x18b   :  { %v1095_v14 = vmax.f32 %v1037_v19, 0.0  ;;  %v1097_v30 = vmax.f32 %v1080_v22, 0.0  ;;  %v4544_v34 = vpack.c.bf16 %v1094_v21, %v1086_v28  ;;  %v4548_v37 = vpack.c.bf16 %v1096_v26, %v1088_v31  ;;  %v4109_v61 = vld [vmem:[#allocation8 + $0x22c] ss:$16 sps:$4 sm:$0xff]   ;;  %v4116_v6 = vld [vmem:[#allocation8 + $0x1e8] ss:$16 sps:$4 sm:$0xff]  }
 0x18c   :  { %v4112_v0 = vld [vmem:[#allocation8 + $0xc] ss:$16 sps:$4 sm:$0xff]   ;;  %v4119_v7 = vld [vmem:[#allocation8 + $0x3e8] ss:$16 sps:$4 sm:$0xff]  }
 0x18d   :  { %v4542_v32 = vpack.c.bf16 %v1095_v14, %v1087_v25  ;;  %2781 = vmatpush2.bf16.msra.mxu0 %v4062_v20  ;;  %v4546_v35 = vpack.c.bf16 %v1097_v30, %v1089_v29  ;;  %2824 = vmatpush2.bf16.msra.mxu1 %v4065_v23  ;;  %v4115_v1 = vld [vmem:[#allocation8 + $0x20c] ss:$16 sps:$4 sm:$0xff]   ;;  %v4122_v10 = vld [vmem:[#allocation8 + $0x1c8] ss:$16 sps:$4 sm:$0xff]  }
 0x18e   :  { %2836 = vmatprep.subr.bf16.mxu0 %v4070_v24  ;;  %2879 = vmatprep.subr.bf16.mxu1 %v4073_v27  ;;  %v4118_v4 = vld [vmem:[#allocation8 + $0x1ec] ss:$16 sps:$4 sm:$0xff]   ;;  %v4125_v18 = vld [vmem:[#allocation8 + $0x3c8] ss:$16 sps:$4 sm:$0xff]  }
 0x18f   :  { %2782 = vmatprep.mubr.bf16.mxu0 %v4542_v32  ;;  %2825 = vmatprep.mubr.bf16.mxu1 %v4546_v35  ;;  %v4121_v5 = vld [vmem:[#allocation8 + $0x3ec] ss:$16 sps:$4 sm:$0xff]   ;;  %v4128_v20 = vld [vmem:[#allocation8 + $0x1a8] ss:$16 sps:$4 sm:$0xff]  }
 0x190   :  { %2783 = vmatmul.mubr.bf16.vlgmr.msra.gmra.mxu0 %v4544_v34  ;;  %2826 = vmatmul.mubr.bf16.vlgmr.msra.gmra.mxu1 %v4548_v37  ;;  %v4124_v8 = vld [vmem:[#allocation8 + $0x1cc] ss:$16 sps:$4 sm:$0xff]   ;;  %v4131_v21 = vld [vmem:[#allocation8 + $0x3a8] ss:$16 sps:$4 sm:$0xff]  }
 0x191   :  { %2837 = vmatpush1.bf16.msra.mxu0 %v4068_v33  ;;  %2880 = vmatpush1.bf16.msra.mxu1 %v4071_v36  ;;  %v4127_v9 = vld [vmem:[#allocation8 + $0x3cc] ss:$16 sps:$4 sm:$0xff]   ;;  %v4134_v24 = vld [vmem:[#allocation8 + $0x188] ss:$16 sps:$4 sm:$0xff]  }
 0x192   :  { %2868 = vmatprep.mubr.bf16.mxu0 %v4522_v58  ;;  %2911 = vmatprep.mubr.bf16.mxu1 %v4526_v47  ;;  %v4089_v58 = vld [vmem:[#allocation8 + $0x288] ss:$16 sps:$4 sm:$0xff]   ;;  %v4130_v19 = vld [vmem:[#allocation8 + $0x1ac] ss:$16 sps:$4 sm:$0xff]  }
 0x193   :  { %2838 = vmatprep.subr.bf16.mxu0 %v4076_v38  ;;  %2881 = vmatprep.subr.bf16.mxu1 %v4079_v39  ;;  %v4092_v47 = vld [vmem:[#allocation8 + $0x68] ss:$16 sps:$4 sm:$0xff]   ;;  %v4133_v16 = vld [vmem:[#allocation8 + $0x3ac] ss:$16 sps:$4 sm:$0xff]  }
 0x194   :  { %v4136_v22 = vld [vmem:[#allocation8 + $0x18c] ss:$16 sps:$4 sm:$0xff]   ;;  %v4137_v25 = vld [vmem:[#allocation8 + $0x388] ss:$16 sps:$4 sm:$0xff]  }
 0x195   :  { %2839 = vmatpush1.bf16.msra.mxu0 %v4074_v40  ;;  %2882 = vmatpush1.bf16.msra.mxu1 %v4077_v41  ;;  %v4139_v23 = vld [vmem:[#allocation8 + $0x38c] ss:$16 sps:$4 sm:$0xff]   ;;  %v4140_v27 = vld [vmem:[#allocation8 + $0x168] ss:$16 sps:$4 sm:$0xff]  }
 0x196   :  { %2840 = vmatprep.subr.bf16.mxu0 %v4082_v42  ;;  %2883 = vmatprep.subr.bf16.mxu1 %v4085_v43  ;;  %v4142_v26 = vld [vmem:[#allocation8 + $0x16c] ss:$16 sps:$4 sm:$0xff]   ;;  %v4143_v28 = vld [vmem:[#allocation8 + $0x368] ss:$16 sps:$4 sm:$0xff]  }
 0x197   :  { %v4145_v14 = vld [vmem:[#allocation8 + $0x36c] ss:$16 sps:$4 sm:$0xff]   ;;  %v4146_v31 = vld [vmem:[#allocation8 + $0x148] ss:$16 sps:$4 sm:$0xff]  }
 0x198   :  { %v4148_v29 = vld [vmem:[#allocation8 + $0x14c] ss:$16 sps:$4 sm:$0xff]   ;;  %v4149_v33 = vld [vmem:[#allocation8 + $0x348] ss:$16 sps:$4 sm:$0xff]  }
 0x199   :  { %2841 = vmatpush1.bf16.msra.mxu0 %v4080_v44  ;;  %2884 = vmatpush1.bf16.msra.mxu1 %v4083_v45  ;;  %v4151_v30 = vld [vmem:[#allocation8 + $0x34c] ss:$16 sps:$4 sm:$0xff]   ;;  %v4152_v39 = vld [vmem:[#allocation8 + $0x128] ss:$16 sps:$4 sm:$0xff]  }
 0x19a   :  { %2842 = vmatprep.subr.bf16.mxu0 %v4088_v48  ;;  %2885 = vmatprep.subr.bf16.mxu1 %v4091_v49  ;;  %v4154_v36 = vld [vmem:[#allocation8 + $0x12c] ss:$16 sps:$4 sm:$0xff]   ;;  %v4155_v40 = vld [vmem:[#allocation8 + $0x328] ss:$16 sps:$4 sm:$0xff]  }
 0x19b   :  { %v4157_v38 = vld [vmem:[#allocation8 + $0x32c] ss:$16 sps:$4 sm:$0xff]   ;;  %v4158_v43 = vld [vmem:[#allocation8 + $0x108] ss:$16 sps:$4 sm:$0xff]  }
 0x19c   :  { %v4160_v41 = vld [vmem:[#allocation8 + $0x10c] ss:$16 sps:$4 sm:$0xff]   ;;  %v4161_v44 = vld [vmem:[#allocation8 + $0x308] ss:$16 sps:$4 sm:$0xff]  }
 0x19d   :  { %2843 = vmatpush1.bf16.msra.mxu0 %v4086_v51  ;;  %2886 = vmatpush1.bf16.msra.mxu1 %v4089_v58  ;;  %v4163_v42 = vld [vmem:[#allocation8 + $0x30c] ss:$16 sps:$4 sm:$0xff]   ;;  %v4164_v49 = vld [vmem:[#allocation8 + $0x4e8] ss:$16 sps:$4 sm:$0xff]  }
 0x19e   :  { %2844 = vmatprep.subr.bf16.mxu0 %v4094_v52  ;;  %2887 = vmatprep.subr.bf16.mxu1 %v4097_v53  ;;  %v4166_v45 = vld [vmem:[#allocation8 + $0x4ec] ss:$16 sps:$4 sm:$0xff]   ;;  %v4167_v51 = vld [vmem:[#allocation8 + $0x6e8] ss:$16 sps:$4 sm:$0xff]  }
 0x19f   :  { %v4169_v48 = vld [vmem:[#allocation8 + $0x6ec] ss:$16 sps:$4 sm:$0xff]   ;;  %v4170_v53 = vld [vmem:[#allocation8 + $0x4c8] ss:$16 sps:$4 sm:$0xff]  }
 0x1a0   :  { %v4172_v58 = vld [vmem:[#allocation8 + $0x4cc] ss:$16 sps:$4 sm:$0xff]  }
 0x1a1   :  { %2845 = vmatpush1.bf16.msra.mxu0 %v4092_v47  ;;  %2888 = vmatpush1.bf16.msra.mxu1 %v4095_v54  ;;  %v4175_v52 = vld [vmem:[#allocation8 + $0x6cc] ss:$16 sps:$4 sm:$0xff]   ;;  %v4173_v47 = vld [vmem:[#allocation8 + $0x6c8] ss:$16 sps:$4 sm:$0xff]  }
 0x1a2   :  { %2846 = vmatprep.subr.bf16.mxu0 %v4100_v55  ;;  %2889 = vmatprep.subr.bf16.mxu1 %v4103_v56  ;;  %v4178_v54 = vld [vmem:[#allocation8 + $0x4ac] ss:$16 sps:$4 sm:$0xff]   ;;  %v4176_v56 = vld [vmem:[#allocation8 + $0x4a8] ss:$16 sps:$4 sm:$0xff]  }
 0x1a3   :  { %v4181_v55 = vld [vmem:[#allocation8 + $0x6ac] ss:$16 sps:$4 sm:$0xff]  }
 0x1a5   :  { %2847 = vmatpush1.bf16.msra.mxu0 %v4098_v57  ;;  %2890 = vmatpush1.bf16.msra.mxu1 %v4101_v59  ;;  %v4184_v57 = vld [vmem:[#allocation8 + $0x48c] ss:$16 sps:$4 sm:$0xff]   ;;  %v4182_v59 = vld [vmem:[#allocation8 + $0x488] ss:$16 sps:$4 sm:$0xff]  }
 0x1a6   :  { %2848 = vmatprep.subr.bf16.mxu0 %v4106_v60  ;;  %2891 = vmatprep.subr.bf16.mxu1 %v4109_v61  ;;  %v4190_v60 = vld [vmem:[#allocation8 + $0x46c] ss:$16 sps:$4 sm:$0xff]  }
 0x1a7   :  { %v4193_v61 = vld [vmem:[#allocation8 + $0x66c] ss:$16 sps:$4 sm:$0xff]  }
 0x1a9   :  { %2849 = vmatpush1.bf16.msra.mxu0 %v4104_v62  ;;  %2892 = vmatpush1.bf16.msra.mxu1 %v4107_v63  ;;  %v4191_v62 = vld [vmem:[#allocation8 + $0x668] ss:$16 sps:$4 sm:$0xff]   ;;  %v4196_v63 = vld [vmem:[#allocation8 + $0x44c] ss:$16 sps:$4 sm:$0xff]  }
 0x1aa   :  { %2850 = vmatprep.subr.bf16.mxu0 %v4112_v0  ;;  %2893 = vmatprep.subr.bf16.mxu1 %v4115_v1  ;;  %v4199_v0 = vld [vmem:[#allocation8 + $0x64c] ss:$16 sps:$4 sm:$0xff]   ;;  %v4194_v1 = vld [vmem:[#allocation8 + $0x448] ss:$16 sps:$4 sm:$0xff]  }
 0x1ad   :  { %2851 = vmatpush1.bf16.msra.mxu0 %v4110_v2  ;;  %2894 = vmatpush1.bf16.msra.mxu1 %v4113_v3  ;;  %v4197_v2 = vld [vmem:[#allocation8 + $0x648] ss:$16 sps:$4 sm:$0xff]   ;;  %v4202_v3 = vld [vmem:[#allocation8 + $0x42c] ss:$16 sps:$4 sm:$0xff]  }
 0x1ae   :  { %2852 = vmatprep.subr.bf16.mxu0 %v4118_v4  ;;  %2895 = vmatprep.subr.bf16.mxu1 %v4121_v5  ;;  %v4205_v4 = vld [vmem:[#allocation8 + $0x62c] ss:$16 sps:$4 sm:$0xff]   ;;  %v4200_v5 = vld [vmem:[#allocation8 + $0x428] ss:$16 sps:$4 sm:$0xff]  }
 0x1b1   :  { %2853 = vmatpush2.bf16.msra.mxu0 %v4116_v6  ;;  %2896 = vmatpush2.bf16.msra.mxu1 %v4119_v7  ;;  %v4203_v6 = vld [vmem:[#allocation8 + $0x628] ss:$16 sps:$4 sm:$0xff]   ;;  %v4208_v7 = vld [vmem:[#allocation8 + $0x40c] ss:$16 sps:$4 sm:$0xff]  }
 0x1b2   :  { %2854 = vmatprep.subr.bf16.mxu0 %v4124_v8  ;;  %2897 = vmatprep.subr.bf16.mxu1 %v4127_v9  ;;  %v4211_v8 = vld [vmem:[#allocation8 + $0x60c] ss:$16 sps:$4 sm:$0xff]   ;;  %v4206_v9 = vld [vmem:[#allocation8 + $0x408] ss:$16 sps:$4 sm:$0xff]  }
 0x1b5   :  { %2855 = vmatpush2.bf16.msra.mxu0 %v4122_v10  ;;  %2898 = vmatpush2.bf16.msra.mxu1 %v4125_v18  ;;  %v4209_v10 = vld [vmem:[#allocation8 + $0x608] ss:$16 sps:$4 sm:$0xff]   ;;  %v4214_v18 = vld [vmem:[#allocation8 + $0x5ec] ss:$16 sps:$4 sm:$0xff]  }
 0x1b6   :  { %2856 = vmatprep.subr.bf16.mxu0 %v4130_v19  ;;  %2899 = vmatprep.subr.bf16.mxu1 %v4133_v16  ;;  %v4217_v19 = vld [vmem:[#allocation8 + $0x7ec] ss:$16 sps:$4 sm:$0xff]   ;;  %v4212_v16 = vld [vmem:[#allocation8 + $0x5e8] ss:$16 sps:$4 sm:$0xff]  }
 0x1b9   :  { %2857 = vmatpush2.bf16.msra.mxu0 %v4128_v20  ;;  %2900 = vmatpush2.bf16.msra.mxu1 %v4131_v21  ;;  %v4215_v20 = vld [vmem:[#allocation8 + $0x7e8] ss:$16 sps:$4 sm:$0xff]   ;;  %v4220_v21 = vld [vmem:[#allocation8 + $0x5cc] ss:$16 sps:$4 sm:$0xff]  }
 0x1ba   :  { %2858 = vmatprep.subr.bf16.mxu0 %v4136_v22  ;;  %2901 = vmatprep.subr.bf16.mxu1 %v4139_v23  ;;  %v4223_v22 = vld [vmem:[#allocation8 + $0x7cc] ss:$16 sps:$4 sm:$0xff]   ;;  %v4218_v23 = vld [vmem:[#allocation8 + $0x5c8] ss:$16 sps:$4 sm:$0xff]  }
 0x1bd   :  { %2859 = vmatpush2.bf16.msra.mxu0 %v4134_v24  ;;  %2902 = vmatpush2.bf16.msra.mxu1 %v4137_v25  ;;  %v4221_v24 = vld [vmem:[#allocation8 + $0x7c8] ss:$16 sps:$4 sm:$0xff]   ;;  %v4226_v25 = vld [vmem:[#allocation8 + $0x5ac] ss:$16 sps:$4 sm:$0xff]  }
 0x1be   :  { %2860 = vmatprep.subr.bf16.mxu0 %v4142_v26  ;;  %2903 = vmatprep.subr.bf16.mxu1 %v4145_v14  ;;  %v4229_v26 = vld [vmem:[#allocation8 + $0x7ac] ss:$16 sps:$4 sm:$0xff]   ;;  %v4224_v14 = vld [vmem:[#allocation8 + $0x5a8] ss:$16 sps:$4 sm:$0xff]  }
 0x1c1   :  { %2861 = vmatpush2.bf16.msra.mxu0 %v4140_v27  ;;  %2904 = vmatpush2.bf16.msra.mxu1 %v4143_v28  ;;  %v4227_v27 = vld [vmem:[#allocation8 + $0x7a8] ss:$16 sps:$4 sm:$0xff]   ;;  %v4232_v28 = vld [vmem:[#allocation8 + $0x58c] ss:$16 sps:$4 sm:$0xff]  }
 0x1c2   :  { %2862 = vmatprep.subr.bf16.mxu0 %v4148_v29  ;;  %2905 = vmatprep.subr.bf16.mxu1 %v4151_v30  ;;  %v4235_v29 = vld [vmem:[#allocation8 + $0x78c] ss:$16 sps:$4 sm:$0xff]   ;;  %v4230_v30 = vld [vmem:[#allocation8 + $0x588] ss:$16 sps:$4 sm:$0xff]  }
 0x1c5   :  { %2863 = vmatpush2.bf16.msra.mxu0 %v4146_v31  ;;  %2906 = vmatpush2.bf16.msra.mxu1 %v4149_v33  ;;  %v4233_v31 = vld [vmem:[#allocation8 + $0x788] ss:$16 sps:$4 sm:$0xff]   ;;  %v4238_v33 = vld [vmem:[#allocation8 + $0x56c] ss:$16 sps:$4 sm:$0xff]  }
 0x1c6   :  { %2864 = vmatprep.subr.bf16.mxu0 %v4154_v36  ;;  %2907 = vmatprep.subr.bf16.mxu1 %v4157_v38  ;;  %v4241_v36 = vld [vmem:[#allocation8 + $0x76c] ss:$16 sps:$4 sm:$0xff]   ;;  %v4236_v38 = vld [vmem:[#allocation8 + $0x568] ss:$16 sps:$4 sm:$0xff]  }
 0x1c9   :  { %2865 = vmatpush2.bf16.msra.mxu0 %v4152_v39  ;;  %2908 = vmatpush2.bf16.msra.mxu1 %v4155_v40  ;;  %v4239_v39 = vld [vmem:[#allocation8 + $0x768] ss:$16 sps:$4 sm:$0xff]   ;;  %v4244_v40 = vld [vmem:[#allocation8 + $0x54c] ss:$16 sps:$4 sm:$0xff]  }
 0x1ca   :  { %2866 = vmatprep.subr.bf16.mxu0 %v4160_v41  ;;  %2909 = vmatprep.subr.bf16.mxu1 %v4163_v42  ;;  %v4247_v41 = vld [vmem:[#allocation8 + $0x74c] ss:$16 sps:$4 sm:$0xff]   ;;  %v4242_v42 = vld [vmem:[#allocation8 + $0x548] ss:$16 sps:$4 sm:$0xff]  }
 0x1cd   :  { %2867 = vmatpush2.bf16.msra.mxu0 %v4158_v43  ;;  %2910 = vmatpush2.bf16.msra.mxu1 %v4161_v44  ;;  %v4245_v43 = vld [vmem:[#allocation8 + $0x748] ss:$16 sps:$4 sm:$0xff]   ;;  %v4250_v44 = vld [vmem:[#allocation8 + $0x52c] ss:$16 sps:$4 sm:$0xff]  }
 0x1ce   :  { %2922 = vmatprep.subr.bf16.mxu0 %v4166_v45  ;;  %2965 = vmatprep.subr.bf16.mxu1 %v4169_v48  ;;  %v4253_v45 = vld [vmem:[#allocation8 + $0x72c] ss:$16 sps:$4 sm:$0xff]   ;;  %v4248_v48 = vld [vmem:[#allocation8 + $0x528] ss:$16 sps:$4 sm:$0xff]  }
 0x1d0   :  { %2869 = vmatmul.mubr.bf16.vlgmr.msra.gmra.mxu0 %v4524_v46  ;;  %2912 = vmatmul.mubr.bf16.vlgmr.msra.gmra.mxu1 %v4528_v50  ;;  %v4179_v46 = vld [vmem:[#allocation8 + $0x6a8] ss:$16 sps:$4 sm:$0xff]   ;;  %v4187_v50 = vld [vmem:[#allocation8 + $0x68c] ss:$16 sps:$4 sm:$0xff]  }
 0x1d1   :  { %2923 = vmatpush1.bf16.msra.mxu0 %v4164_v49  ;;  %2954 = vmatprep.mubr.bf16.mxu0 %v4542_v32  ;;  %v4185_v32 = vld [vmem:[#allocation8 + $0x688] ss:$16 sps:$4 sm:$0xff]  }
 0x1d2   :  { %2966 = vmatpush1.bf16.msra.mxu1 %v4167_v51  ;;  %2997 = vmatprep.mubr.bf16.mxu1 %v4546_v35  ;;  %v4188_v35 = vld [vmem:[#allocation8 + $0x468] ss:$16 sps:$4 sm:$0xff]   ;;  %v4256_v51 = vld [vmem:[#allocation8 + $0x50c] ss:$16 sps:$4 sm:$0xff]  }
 0x1d3   :  { %2924 = vmatprep.subr.bf16.mxu0 %v4172_v58  ;;  %2967 = vmatprep.subr.bf16.mxu1 %v4175_v52  ;;  %v4251_v49 = vld [vmem:[#allocation8 + $0x728] ss:$16 sps:$4 sm:$0xff]   ;;  %v4259_v58 = vld [vmem:[#allocation8 + $0x70c] ss:$16 sps:$4 sm:$0xff]  }
 0x1d4   :  { %v4254_v52 = vld [vmem:[#allocation8 + $0x508] ss:$16 sps:$4 sm:$0xff]  }
 0x1d5   :  { %2925 = vmatpush1.bf16.msra.mxu0 %v4170_v53  ;;  %v4257_v53 = vld [vmem:[#allocation8 + $0x708] ss:$16 sps:$4 sm:$0xff]  }
 0x1d6   :  { %2968 = vmatpush1.bf16.msra.mxu1 %v4173_v47  ;;  %2926 = vmatprep.subr.bf16.mxu0 %v4178_v54  ;;  %v4260_v47 = vld [vmem:[#allocation10 + $0x78] sm:$0xff]  }
 0x1d7   :  { %2969 = vmatprep.subr.bf16.mxu1 %v4181_v55  ;;  %v4261_v54 = vld [vmem:[#allocation10 + $0x38] sm:$0xff]   ;;  %v4262_v55 = vld [vmem:[#allocation10 + $0x70] sm:$0xff]  }
 0x1d9   :  { %2927 = vmatpush1.bf16.msra.mxu0 %v4176_v56  ;;  %v4263_v56 = vld [vmem:[#allocation10 + $0x30] sm:$0xff]  }
 0x1da   :  { %2970 = vmatpush1.bf16.msra.mxu1 %v4179_v46  ;;  %2928 = vmatprep.subr.bf16.mxu0 %v4184_v57  ;;  %v4264_v46 = vld [vmem:[#allocation10 + $0x68] sm:$0xff]  }
 0x1db   :  { %2971 = vmatprep.subr.bf16.mxu1 %v4187_v50  ;;  %v4265_v57 = vld [vmem:[#allocation10 + $0x28] sm:$0xff]   ;;  %v4266_v50 = vld [vmem:[#allocation10 + $0x60] sm:$0xff]  }
 0x1dd   :  { %2929 = vmatpush1.bf16.msra.mxu0 %v4182_v59  ;;  %v4267_v59 = vld [vmem:[#allocation10 + $0x20] sm:$0xff]  }
 0x1de   :  { %2972 = vmatpush1.bf16.msra.mxu1 %v4185_v32  ;;  %2930 = vmatprep.subr.bf16.mxu0 %v4190_v60  ;;  %v4276_v32 = vld [vmem:[#allocation10 + $0xf8] sm:$0xff]  }
 0x1df   :  { %2973 = vmatprep.subr.bf16.mxu1 %v4193_v61  ;;  %v4277_v60 = vld [vmem:[#allocation10 + $0xb8] sm:$0xff]   ;;  %v4278_v61 = vld [vmem:[#allocation10 + $0xf0] sm:$0xff]  }
 0x1e1   :  { %2931 = vmatpush1.bf16.msra.mxu0 %v4188_v35  ;;  %v4268_v35 = vld [vmem:[#allocation10 + $0x58] sm:$0xff]  }
 0x1e2   :  { %2974 = vmatpush1.bf16.msra.mxu1 %v4191_v62  ;;  %2932 = vmatprep.subr.bf16.mxu0 %v4196_v63  ;;  %v4280_v62 = vld [vmem:[#allocation10 + $0xe8] sm:$0xff]   ;;  %v4270_v63 = vld [vmem:[#allocation10 + $0x50] sm:$0xff]  }
 0x1e3   :  { %2975 = vmatprep.subr.bf16.mxu1 %v4199_v0  ;;  %v4281_v0 = vld [vmem:[#allocation10 + $0xa8] sm:$0xff]  }
 0x1e5   :  { %2933 = vmatpush1.bf16.msra.mxu0 %v4194_v1  ;;  %v4271_v1 = vld [vmem:[#allocation10 + $0x10] sm:$0xff]  }
 0x1e6   :  { %2976 = vmatpush1.bf16.msra.mxu1 %v4197_v2  ;;  %2934 = vmatprep.subr.bf16.mxu0 %v4202_v3  ;;  %v4282_v2 = vld [vmem:[#allocation10 + $0xe0] sm:$0xff]   ;;  %v4272_v3 = vld [vmem:[#allocation10 + $0x48] sm:$0xff]  }
 0x1e7   :  { %2977 = vmatprep.subr.bf16.mxu1 %v4205_v4  ;;  %v4283_v4 = vld [vmem:[#allocation10 + $0xa0] sm:$0xff]  }
 0x1e9   :  { %2935 = vmatpush1.bf16.msra.mxu0 %v4200_v5  ;;  %v4273_v5 = vld [vmem:[#allocation10 + $0x8] sm:$0xff]  }
 0x1ea   :  { %2978 = vmatpush1.bf16.msra.mxu1 %v4203_v6  ;;  %2936 = vmatprep.subr.bf16.mxu0 %v4208_v7  ;;  %v4274_v6 = vld [vmem:[#allocation10 + $0x40] sm:$0xff]  }
 0x1eb   :  { %2979 = vmatprep.subr.bf16.mxu1 %v4211_v8  ;;  %v4275_v7 = vld [vmem:[#allocation10] sm:$0xff]  }
 0x1ed   :  { %2937 = vmatpush1.bf16.msra.mxu0 %v4206_v9 }
 0x1ee   :  { %2980 = vmatpush1.bf16.msra.mxu1 %v4209_v10  ;;  %2938 = vmatprep.subr.bf16.mxu0 %v4214_v18  ;;  %v1362_v18 = vld [vmem:[%s4586_s4] sm:$0xf] }
 0x1ef   :  { %2981 = vmatprep.subr.bf16.mxu1 %v4217_v19 }
 0x1f1   :  { %2939 = vmatpush2.bf16.msra.mxu0 %v4212_v16  ;;  %v1371_v16 = vrot.slane %v1362_v18, %v236_v12 }
 0x1f2   :  { %2982 = vmatpush2.bf16.msra.mxu1 %v4215_v20  ;;  %2940 = vmatprep.subr.bf16.mxu0 %v4220_v21  ;;  %v1367_v20 = vrot.slane %v1362_v18, %v232_v13 }
 0x1f3   :  { %2983 = vmatprep.subr.bf16.mxu1 %v4223_v22 }
 0x1f5   :  { %2941 = vmatpush2.bf16.msra.mxu0 %v4218_v23 }
 0x1f6   :  { %2984 = vmatpush2.bf16.msra.mxu1 %v4221_v24  ;;  %2942 = vmatprep.subr.bf16.mxu0 %v4226_v25 }
 0x1f7   :  { %2985 = vmatprep.subr.bf16.mxu1 %v4229_v26 }
 0x1f9   :  { %2943 = vmatpush2.bf16.msra.mxu0 %v4224_v14 }
 0x1fa   :  { %2986 = vmatpush2.bf16.msra.mxu1 %v4227_v27  ;;  %2944 = vmatprep.subr.bf16.mxu0 %v4232_v28  ;;  %v4284_v28 = vld [vmem:[#allocation10 + $0xd8] sm:$0xff]  }
 0x1fb   :  { %2987 = vmatprep.subr.bf16.mxu1 %v4235_v29 }
 0x1fd   :  { %2945 = vmatpush2.bf16.msra.mxu0 %v4230_v30 }
 0x1fe   :  { %2988 = vmatpush2.bf16.msra.mxu1 %v4233_v31  ;;  %2946 = vmatprep.subr.bf16.mxu0 %v4238_v33  ;;  %v4285_v33 = vld [vmem:[#allocation10 + $0x98] sm:$0xff]  }
 0x1ff   :  { %2989 = vmatprep.subr.bf16.mxu1 %v4241_v36 }
 0x201   :  { %2947 = vmatpush2.bf16.msra.mxu0 %v4236_v38 }
 0x202   :  { %2990 = vmatpush2.bf16.msra.mxu1 %v4239_v39  ;;  %2948 = vmatprep.subr.bf16.mxu0 %v4244_v40 }
 0x203   :  { %2991 = vmatprep.subr.bf16.mxu1 %v4247_v41 }
 0x205   :  { %2949 = vmatpush2.bf16.msra.mxu0 %v4242_v42  ;;  %v4286_v42 = vld [vmem:[#allocation10 + $0xd0] sm:$0xff]  }
 0x206   :  { %2992 = vmatpush2.bf16.msra.mxu1 %v4245_v43  ;;  %2950 = vmatprep.subr.bf16.mxu0 %v4250_v44 }
 0x207   :  { %2993 = vmatprep.subr.bf16.mxu1 %v4253_v45 }
 0x209   :  { %2951 = vmatpush2.bf16.msra.mxu0 %v4248_v48  ;;  %v4287_v48 = vld [vmem:[#allocation10 + $0x90] sm:$0xff]  }
 0x20a   :  { %2994 = vmatpush2.bf16.msra.mxu1 %v4251_v49  ;;  %2952 = vmatprep.subr.bf16.mxu0 %v4256_v51 }
 0x20b   :  { %2995 = vmatprep.subr.bf16.mxu1 %v4259_v58 }
 0x20d   :  { %2953 = vmatpush2.bf16.msra.mxu0 %v4254_v52 }
 0x20e   :  { %2996 = vmatpush2.bf16.msra.mxu1 %v4257_v53  ;;  %3820 = vmatprep.subr.bf16.mxu0 %v4260_v47 }
 0x20f   :  { %3842 = vmatprep.subr.bf16.mxu1 %v4276_v32  ;;  %v4290_v32 = vld [vmem:[#allocation10 + $0xc0] sm:$0xff]  }
 0x210   :  { %2955 = vmatmul.mubr.bf16.vlgmr.msra.gmra.mxu0 %v4544_v34  ;;  %v4279_v34 = vld [vmem:[#allocation10 + $0xb0] sm:$0xff]   ;;  %v2698_v8 = vpop.f32.mrf.mxu0  ;;  %v2741_v9 = vpop.f32.mrf.mxu1 }
 0x211   :  { %2998 = vmatmul.mubr.bf16.vlgmr.msra.gmra.mxu1 %v4548_v37  ;;  %3821 = vmatpush3.bf16.msra.mxu0 %v4261_v54  ;;  %v4269_v37 = vld [vmem:[#allocation10 + $0x18] sm:$0xff]   ;;  %v2699_v24 = vadd.f32 %v2698_v8, %v1367_v20  ;;  %v4288_v54 = vld [vmem:[#allocation10 + $0xc8] sm:$0xff]  }
 0x212   :  { %3822 = vmatprep.subr.bf16.mxu0 %v4262_v55  ;;  %3843 = vmatpush3.bf16.msra.mxu1 %v4277_v60  ;;  %v2700_v10 = vpop.f32.mrf.mxu0  ;;  %v2743_v19 = vpop.f32.mrf.mxu1 }
 0x213   :  { %3844 = vmatprep.subr.bf16.mxu1 %v4278_v61  ;;  %v2701_v23 = vadd.f32 %v2700_v10, %v1371_v16  ;;  %v2742_v36 = vadd.f32 %v2741_v9, %v2699_v24  ;;  %v4291_v61 = vld [vmem:[#allocation10 + $0x80] sm:$0xff]  }
 0x214   :  { %v2702_v21 = vpop.f32.mrf.mxu0  ;;  %v2745_v22 = vpop.f32.mrf.mxu1 }
 0x215   :  { %3823 = vmatpush3.bf16.msra.mxu0 %v4263_v56  ;;  %v2703_v26 = vadd.f32 %v2702_v21, %v1367_v20  ;;  %v2744_v29 = vadd.f32 %v2743_v19, %v2701_v23  ;;  %v4289_v56 = vld [vmem:[#allocation10 + $0x88] sm:$0xff]  }
 0x216   :  { %3824 = vmatprep.subr.bf16.mxu0 %v4264_v46  ;;  %3845 = vmatpush3.bf16.msra.mxu1 %v4279_v34  ;;  %v2704_v25 = vpop.f32.mrf.mxu0  ;;  %v2747_v14 = vpop.f32.mrf.mxu1 }
 0x217   :  { %3846 = vmatprep.subr.bf16.mxu1 %v4280_v62  ;;  %v2705_v30 = vadd.f32 %v2704_v25, %v1371_v16  ;;  %v2746_v12 = vadd.f32 %v2745_v22, %v2703_v26 }
 0x219   :  { %3825 = vmatpush3.bf16.msra.mxu0 %v4265_v57  ;;  %v2748_v43 = vadd.f32 %v2747_v14, %v2705_v30 }
 0x21a   :  { %3826 = vmatprep.subr.bf16.mxu0 %v4266_v50  ;;  %3847 = vmatpush3.bf16.msra.mxu1 %v4281_v0  ;;  %v1379_v0 = vrot.slane %v1362_v18, %v244_v15 }
 0x21b   :  { %3848 = vmatprep.subr.bf16.mxu1 %v4282_v2 }
 0x21d   :  { %3827 = vmatpush3.bf16.msra.mxu0 %v4267_v59 }
 0x21e   :  { %3828 = vmatprep.subr.bf16.mxu0 %v4268_v35  ;;  %3849 = vmatpush3.bf16.msra.mxu1 %v4283_v4 }
 0x21f   :  { %3850 = vmatprep.subr.bf16.mxu1 %v4284_v28 }
 0x221   :  { %3829 = vmatpush3.bf16.msra.mxu0 %v4269_v37 }
 0x222   :  { %3830 = vmatprep.subr.bf16.mxu0 %v4270_v63  ;;  %3851 = vmatpush3.bf16.msra.mxu1 %v4285_v33 }
 0x223   :  { %3852 = vmatprep.subr.bf16.mxu1 %v4286_v42 }
 0x225   :  { %3831 = vmatpush3.bf16.msra.mxu0 %v4271_v1  ;;  %v1375_v1 = vrot.slane %v1362_v18, %v240_v17 }
 0x226   :  { %3832 = vmatprep.subr.bf16.mxu0 %v4272_v3  ;;  %3853 = vmatpush3.bf16.msra.mxu1 %v4287_v48 }
 0x227   :  { %3854 = vmatprep.subr.bf16.mxu1 %v4288_v54 }
 0x229   :  { %3833 = vmatpush3.bf16.msra.mxu0 %v4273_v5 }
 0x22a   :  { %3834 = vmatprep.subr.bf16.mxu0 %v4274_v6  ;;  %3855 = vmatpush3.bf16.msra.mxu1 %v4289_v56 }
 0x22b   :  { %3856 = vmatprep.subr.bf16.mxu1 %v4290_v32 }
 0x22d   :  { %3835 = vmatpush3.bf16.msra.mxu0 %v4275_v7 }
 0x22e   :  { %3857 = vmatpush3.bf16.msra.mxu1 %v4291_v61 }
 0x250   :  { %v2784_v27 = vpop.f32.mrf.mxu0  ;;  %v2827_v31 = vpop.f32.mrf.mxu1 }
 0x251   :  { %v2785_v13 = vadd.f32 %v2784_v27, %v2742_v36 }
 0x252   :  { %v2786_v38 = vpop.f32.mrf.mxu0  ;;  %v2829_v40 = vpop.f32.mrf.mxu1 }
 0x253   :  { %v2787_v39 = vadd.f32 %v2786_v38, %v2744_v29  ;;  %v2828_v53 = vadd.f32 %v2827_v31, %v2785_v13 }
 0x254   :  { %v2788_v41 = vpop.f32.mrf.mxu0  ;;  %v2831_v45 = vpop.f32.mrf.mxu1 }
 0x255   :  { %v2789_v44 = vadd.f32 %v2788_v41, %v2746_v12  ;;  %v2830_v51 = vadd.f32 %v2829_v40, %v2787_v39  ;;  %v3008_v59 = vmax.f32 %v2828_v53, 0.0 }
 0x256   :  { %v2790_v49 = vpop.f32.mrf.mxu0  ;;  %v2833_v47 = vpop.f32.mrf.mxu1 }
 0x257   :  { %v2832_v58 = vadd.f32 %v2831_v45, %v2789_v44  ;;  %v2791_v52 = vadd.f32 %v2790_v49, %v2748_v43  ;;  %v3009_v57 = vmax.f32 %v2830_v51, 0.0  ;;  %v3778_v51 = vld [vmem:[%s4588_s6] ss:$0 sm:$0xff] }
 0x259   :  { %v2834_v55 = vadd.f32 %v2833_v47, %v2791_v52  ;;  %v3012_v46 = vmax.f32 %v2832_v58, 0.0 }
 0x25b   :  { %v3013_v50 = vmax.f32 %v2834_v55, 0.0  ;;  %v3016_v35 = vpack.c.bf16 %v3012_v46, %v3008_v59 }
 0x25d   :  { %v3017_v60 = vpack.c.bf16 %v3013_v50, %v3009_v57 }
 0x25f   :  { %3315 = vmatprep.mubr.bf16.mxu0 %v3017_v60 }
 0x260   :  { %3316 = vmatmul.mubr.bf16.vlgmr.msra.gmra.mxu0 %v3016_v35 }
 0x290   :  { %v2870_v34 = vpop.f32.mrf.mxu0  ;;  %v2913_v37 = vpop.f32.mrf.mxu1 }
 0x291   :  { %v2871_v5 = vadd.f32 %v2870_v34, %v1375_v1 }
 0x292   :  { %v2872_v62 = vpop.f32.mrf.mxu0  ;;  %v2915_v63 = vpop.f32.mrf.mxu1 }
 0x293   :  { %v2873_v4 = vadd.f32 %v2872_v62, %v1379_v0  ;;  %v2914_v20 = vadd.f32 %v2913_v37, %v2871_v5 }
 0x294   :  { %v2874_v2 = vpop.f32.mrf.mxu0  ;;  %v2917_v3 = vpop.f32.mrf.mxu1 }
 0x295   :  { %v2875_v7 = vadd.f32 %v2874_v2, %v1375_v1  ;;  %v2916_v10 = vadd.f32 %v2915_v63, %v2873_v4 }
 0x296   :  { %v2876_v6 = vpop.f32.mrf.mxu0  ;;  %v2919_v8 = vpop.f32.mrf.mxu1 }
 0x297   :  { %v2877_v19 = vadd.f32 %v2876_v6, %v1379_v0  ;;  %v2918_v22 = vadd.f32 %v2917_v3, %v2875_v7 }
 0x299   :  { %v2920_v11 = vadd.f32 %v2919_v8, %v2877_v19 }
 0x2d0   :  { %v2956_v9 = vpop.f32.mrf.mxu0 }
 0x2d1   :  { %v2999_v16 = vpop.f32.mrf.mxu1  ;;  %v2957_v15 = vadd.f32 %v2956_v9, %v2914_v20 }
 0x2d2   :  { %v2958_v21 = vpop.f32.mrf.mxu0 }
 0x2d3   :  { %v2959_v23 = vadd.f32 %v2958_v21, %v2916_v10  ;;  %v3001_v24 = vpop.f32.mrf.mxu1  ;;  %v3000_v29 = vadd.f32 %v2999_v16, %v2957_v15 }
 0x2d4   :  { %v2960_v25 = vpop.f32.mrf.mxu0 }
 0x2d5   :  { %v2961_v17 = vadd.f32 %v2960_v25, %v2918_v22  ;;  %v3003_v18 = vpop.f32.mrf.mxu1  ;;  %v3002_v14 = vadd.f32 %v3001_v24, %v2959_v23  ;;  %v3010_v12 = vmax.f32 %v3000_v29, 0.0 }
 0x2d6   :  { %v2962_v26 = vpop.f32.mrf.mxu0 }
 0x2d7   :  { %v3004_v27 = vadd.f32 %v3003_v18, %v2961_v17  ;;  %v2963_v28 = vadd.f32 %v2962_v26, %v2920_v11  ;;  %v3005_v30 = vpop.f32.mrf.mxu1  ;;  %v3011_v36 = vmax.f32 %v3002_v14, 0.0 }
 0x2d9   :  { %v3006_v31 = vadd.f32 %v3005_v30, %v2963_v28  ;;  %v3014_v33 = vmax.f32 %v3004_v27, 0.0 }
 0x2db   :  { %v3015_v38 = vmax.f32 %v3006_v31, 0.0  ;;  %v3018_v40 = vpack.c.bf16 %v3014_v33, %v3010_v12 }
 0x2dd   :  { %v3019_v39 = vpack.c.bf16 %v3015_v38, %v3011_v36 }
 0x2df   :  { %3356 = vmatprep.mubr.bf16.mxu1 %v3019_v39 }
 0x2e0   :  { %3357 = vmatmul.mubr.bf16.vlgmr.msra.gmra.mxu1 %v3018_v40 }
 0x320   :  { %v3836_v13 = vpop.f32.mrf.mxu0 }
 0x322   :  { %v3837_v41 = vpop.f32.mrf.mxu0 }
 0x323   :  { %v3838_v48 = vadd.f32 %v3837_v41, %v3836_v13 }
 0x324   :  { %v3839_v42 = vpop.f32.mrf.mxu0 }
 0x325   :  { %v3318_v47 = vadd.f32 %v3838_v48, %v3778_v51 }
 0x326   :  { %v3840_v43 = vpop.f32.mrf.mxu0 }
 0x327   :  { %v3841_v49 = vadd.f32 %v3840_v43, %v3839_v42 }
 0x329   :  { %v3321_v54 = vadd.f32 %v3841_v49, %v3778_v51 }
 0x3a0   :  { %v3858_v44 = vpop.f32.mrf.mxu1 }
 0x3a2   :  { %v3859_v45 = vpop.f32.mrf.mxu1 }
 0x3a3   :  { %v3860_v52 = vadd.f32 %v3859_v45, %v3858_v44 }
 0x3a4   :  { %v3861_v58 = vpop.f32.mrf.mxu1 }
 0x3a5   :  { %v3359_v56 = vadd.f32 %v3860_v52, %v3318_v47 }
 0x3a6   :  { %v3862_v53 = vpop.f32.mrf.mxu1 }
 0x3a7   :  { %v3863_v55 = vadd.f32 %v3862_v53, %v3861_v58 }
 0x3a9   :  { %v3362_v46 = vadd.f32 %v3863_v55, %v3321_v54 }
 0x3ab   :  { %v3818_v57 = vpack.c.bf16 %v3362_v46, %v3359_v56 }
 0x3ad   :  { %3819 = vst [vmem:[#allocation11] sm:$0xff] %v3818_v57  }
 0x3ae   :  { %4403 = shalt.err (!%p4400_p1)
}
 0x3af   :  { %3386 = dma.vmem_to_hbm [thread:$0]  %s3381_s8, 128, %s4589_s7, [#allocation4], %s4429_s0, %s4429_s0, %s4430_s26  }
 0x3b0   :  { %4418 = dma.done.wait [#allocation4], 128  }
 0x3b1   :  { %4419 = vsyncadd [#allocation4], 4294967168 }
 0x3b2   :  { %3390 = vsyncpa [#allocation3], 1 }
 0x3b3   :  { %3391 = vsyncpa [#allocation6], 1 }
 0x3b4   :  { %3392 = vsyncpa [#allocation9], 1 }
 0x3b5   :  { %3393 = vsyncpa [#allocation4], 1 }

</bundles_post_ra>
